<compile_context>
chip_gen: v6e
topology: v6e:2x2x1
jax: 0.10.0
libtpu: 0.0.40
codegen_flags: <defaults>
</compile_context>

<pallas_src>
import jax
import jax.numpy as jnp
from jax import lax
from jax.experimental import pallas as pl
from jax.experimental.pallas import tpu as pltpu


# ---------------------------------------------------------------------------
# Problem configuration (matches the PyTorch module defaults)
# ---------------------------------------------------------------------------
BATCH = 2
INPUT_DIM = 4
HIDDEN_DIM = 32
H = W = 16
KH = KW = 3
PAD = 1          # "same" padding for 3x3
STRIDE = 1       # this kernel implements the module-default stride=1

CIN = INPUT_DIM + HIDDEN_DIM          # conv input channels       (36)
COUT = 4 * HIDDEN_DIM                 # i, f, o, g gate channels  (128)
KPATCH = KH * KW * CIN                # im2col contraction dim    (324)


def _num_lane_blocks():
    """2-way parallel grid on multi-TensorCore chips, single step otherwise."""
    try:
        kind = jax.devices()[0].device_kind.lower()
    except Exception:
        return 1
    return 2 if any(t in kind for t in ("v7", "v5p", "v4")) else 1


# ---------------------------------------------------------------------------
# Pallas kernel: one MXU matmul + gate math, channel-major / lane-dense layout
# ---------------------------------------------------------------------------
def convlstm_cell_kernel(w_ref, b_ref, patch_ref, c_ref, h_out_ref, c_out_ref):
    # w_ref     : (COUT, KPATCH)   flattened conv weights
    # b_ref     : (COUT, 1)        conv bias (broadcast along lanes)
    # patch_ref : (KPATCH, TM)     im2col patches, TM = (B*H*W)/nblk lanes
    # c_ref     : (HIDDEN, TM)     current cell state, channel-major
    # h_out_ref : (HIDDEN, TM)
    # c_out_ref : (HIDDEN, TM)
    gates = jnp.dot(w_ref[...], patch_ref[...],
                    preferred_element_type=jnp.float32)        # (COUT, TM)
    gates = gates + b_ref[...]                                  # (COUT,1) bcast

    # One sigmoid over the full 128-sublane block covers i, f, o; the gate
    # slabs are sublane slices at multiples of 8 -> no lane masking / XLU work.
    sig = jax.nn.sigmoid(gates)
    i_g = sig[0 * HIDDEN_DIM:1 * HIDDEN_DIM, :]
    f_g = sig[1 * HIDDEN_DIM:2 * HIDDEN_DIM, :]
    o_g = sig[2 * HIDDEN_DIM:3 * HIDDEN_DIM, :]
    g_g = jnp.tanh(gates[3 * HIDDEN_DIM:4 * HIDDEN_DIM, :])

    c_cur = c_ref[...]
    c_next = f_g * c_cur + i_g * g_g
    h_next = o_g * jnp.tanh(c_next)

    h_out_ref[...] = h_next.astype(h_out_ref.dtype)
    c_out_ref[...] = c_next.astype(c_out_ref.dtype)


# ---------------------------------------------------------------------------
# Wrapper: NCHW (PyTorch convention) in / out, channel-major inside
# ---------------------------------------------------------------------------
@jax.jit
def convlstm_cell_forward(x_nchw, h_nchw, c_nchw, w_oihw, bias):
    """x: (B, Cin_x, H, W), h/c: (B, hid, H, W), w: (4*hid, Cin, KH, KW)."""
    B = x_nchw.shape[0]
    M = B * H * W
    nblk = _num_lane_blocks()
    tm = M // nblk

    xf = x_nchw.astype(jnp.float32)
    hf = h_nchw.astype(jnp.float32)

    # NCHW is already channel-major: concat + pad without any transposes.
    comb = jnp.concatenate([xf, hf], axis=1)                         # (B,CIN,H,W)
    comb_p = jnp.pad(comb, ((0, 0), (0, 0), (PAD, PAD), (PAD, PAD)))

    # im2col: patches[k*CIN + cin, b*H*W + y*W + x] = comb_p[b, cin, y+kh, x+kw]
    slabs = [comb_p[:, :, kh:kh + H, kw:kw + W]
             for kh in range(KH) for kw in range(KW)]                # 9x(B,CIN,H,W)
    patches = jnp.stack(slabs, axis=0)                               # (9,B,CIN,H,W)
    patches = patches.transpose(0, 2, 1, 3, 4).reshape(KPATCH, M)    # (324, M)

    # weights: w_flat[cout, k*CIN + cin] = w[cout, cin, kh, kw]  (matches above)
    w_flat = jnp.transpose(w_oihw.astype(jnp.float32),
                           (0, 2, 3, 1)).reshape(COUT, KPATCH)       # (128, 324)
    b_col = bias.astype(jnp.float32).reshape(COUT, 1)                # (128, 1)

    # cell state channel-major, lane-dense: (HIDDEN, B*H*W)
    c_t = jnp.transpose(c_nchw.astype(jnp.float32),
                        (1, 0, 2, 3)).reshape(HIDDEN_DIM, M)

    out_shapes = (
        jax.ShapeDtypeStruct((HIDDEN_DIM, M), jnp.float32),
        jax.ShapeDtypeStruct((HIDDEN_DIM, M), jnp.float32),
    )

    h_t, c_nt = pl.pallas_call(
        convlstm_cell_kernel,
        out_shape=out_shapes,
        grid=(nblk,),
        in_specs=[
            pl.BlockSpec((COUT, KPATCH), lambda i: (0, 0)),
            pl.BlockSpec((COUT, 1), lambda i: (0, 0)),
            pl.BlockSpec((KPATCH, tm), lambda i: (0, i)),
            pl.BlockSpec((HIDDEN_DIM, tm), lambda i: (0, i)),
        ],
        out_specs=[
            pl.BlockSpec((HIDDEN_DIM, tm), lambda i: (0, i)),
            pl.BlockSpec((HIDDEN_DIM, tm), lambda i: (0, i)),
        ],
        compiler_params=pltpu.CompilerParams(
            dimension_semantics=("parallel",)),
    )(w_flat, b_col, patches, c_t)

    # channel-major -> NCHW to match the PyTorch output convention.
    h_next = h_t.reshape(HIDDEN_DIM, B, H, W).transpose(1, 0, 2, 3)
    c_next = c_nt.reshape(HIDDEN_DIM, B, H, W).transpose(1, 0, 2, 3)
    return h_next, c_next


# ---------------------------------------------------------------------------
# Pure-JAX reference (mirrors the PyTorch forward) for a correctness check
# ---------------------------------------------------------------------------
def convlstm_cell_ref(x, h, c, w_oihw, bias):
    combined = jnp.concatenate([x, h], axis=1)                       # NCHW
    conv = lax.conv_general_dilated(
        combined, w_oihw, window_strides=(STRIDE, STRIDE),
        padding=((PAD, PAD), (PAD, PAD)),
        dimension_numbers=("NCHW", "OIHW", "NCHW"))
    conv = conv + bias.reshape(1, COUT, 1, 1)
    i_g, f_g, o_g, g_g = jnp.split(conv, 4, axis=1)
    i_g = jax.nn.sigmoid(i_g)
    f_g = jax.nn.sigmoid(f_g)
    o_g = jax.nn.sigmoid(o_g)
    g_g = jnp.tanh(g_g)
    c_next = f_g * c + i_g * g_g
    h_next = o_g * jnp.tanh(c_next)
    return h_next, c_next


if __name__ == "__main__":
    key = jax.random.PRNGKey(0)
    k_x, k_h, k_c, k_w, k_b = jax.random.split(key, 5)

    # Deterministic synthetic parameters (same shapes as nn.Conv2d in __init__).
    w = jax.random.normal(k_w, (COUT, CIN, KH, KW), jnp.float32) * 0.05
    b = jax.random.normal(k_b, (COUT,), jnp.float32) * 0.05

    # Inputs (NCHW, matching the PyTorch forward signature).
    x = jax.random.normal(k_x, (BATCH, INPUT_DIM, H, W), jnp.float32)
    h0 = jax.random.normal(k_h, (BATCH, HIDDEN_DIM, H, W), jnp.float32)
    c0 = jax.random.normal(k_c, (BATCH, HIDDEN_DIM, H, W), jnp.float32)

    h_next, c_next = convlstm_cell_forward(x, h0, c0, w, b)
    jax.block_until_ready((h_next, c_next))

    h_ref, c_ref = convlstm_cell_ref(x, h0, c0, w, b)
    assert jnp.max(jnp.abs(h_next - h_ref)) < 1e-4
    assert jnp.max(jnp.abs(c_next - c_ref)) < 1e-4

    print("KERNEL_OK")
</pallas_src>

<mosaic_0001>
module attributes {stable_mosaic.version = 11 : i64} {
  func.func @convlstm_cell_kernel(%arg0: i32, %arg1: memref<128x324xf32, #tpu.memory_space<vmem>>, %arg2: memref<128x1xf32, #tpu.memory_space<vmem>>, %arg3: memref<324x512xf32, #tpu.memory_space<vmem>>, %arg4: memref<32x512xf32, #tpu.memory_space<vmem>>, %arg5: memref<32x512xf32, #tpu.memory_space<vmem>>, %arg6: memref<32x512xf32, #tpu.memory_space<vmem>>) attributes {dimension_semantics = [#tpu.dimension_semantics<parallel>], iteration_bounds = array<i64: 1>, scalar_prefetch = 0 : i64, scratch_operands = 0 : i64, tpu.core_type = #tpu.core_type<tc>, window_params = [{pipeline_mode = #tpu.pipeline_mode<synchronous>, transform_indices = @transform_0, window_bounds = array<i64: 128, 324>}, {pipeline_mode = #tpu.pipeline_mode<synchronous>, transform_indices = @transform_1, window_bounds = array<i64: 128, 1>}, {transform_indices = @transform_2, window_bounds = array<i64: 324, 512>}, {transform_indices = @transform_3, window_bounds = array<i64: 32, 512>}, {transform_indices = @transform_4, window_bounds = array<i64: 32, 512>}, {transform_indices = @transform_5, window_bounds = array<i64: 32, 512>}]} {
    %c0 = arith.constant 0 : index
    %c0_0 = arith.constant 0 : index
    %0 = vector.load %arg1[%c0, %c0_0] : memref<128x324xf32, #tpu.memory_space<vmem>>, vector<128x324xf32>
    %c0_1 = arith.constant 0 : index
    %c0_2 = arith.constant 0 : index
    %1 = vector.load %arg3[%c0_1, %c0_2] : memref<324x512xf32, #tpu.memory_space<vmem>>, vector<324x512xf32>
    %cst = arith.constant dense<0.000000e+00> : vector<128x512xf32>
    %2 = tpu.matmul %0, %1, %cst {dimension_numbers = #tpu.dot_dimension_numbers<[1], [0], [0], [1], [0, 0, 1, 1], [], []>} : vector<128x324xf32>, vector<324x512xf32>, vector<128x512xf32> -> vector<128x512xf32>
    %c0_3 = arith.constant 0 : index
    %c0_4 = arith.constant 0 : index
    %3 = vector.load %arg2[%c0_3, %c0_4] : memref<128x1xf32, #tpu.memory_space<vmem>>, vector<128x1xf32>
    %4 = vector.broadcast %3 : vector<128x1xf32> to vector<128x512xf32>
    %5 = arith.addf %2, %4 : vector<128x512xf32>
    %6 = arith.negf %5 : vector<128x512xf32>
    %7 = math.exp %6 : vector<128x512xf32>
    %cst_5 = arith.constant 1.000000e+00 : f32
    %8 = vector.broadcast %cst_5 : f32 to vector<128x512xf32>
    %9 = arith.addf %8, %7 : vector<128x512xf32>
    %10 = arith.divf %8, %9 : vector<128x512xf32>
    %11 = vector.extract_strided_slice %10 {offsets = [0, 0], sizes = [32, 512], strides = [1, 1]} : vector<128x512xf32> to vector<32x512xf32>
    %12 = vector.extract_strided_slice %10 {offsets = [32, 0], sizes = [32, 512], strides = [1, 1]} : vector<128x512xf32> to vector<32x512xf32>
    %13 = vector.extract_strided_slice %10 {offsets = [64, 0], sizes = [32, 512], strides = [1, 1]} : vector<128x512xf32> to vector<32x512xf32>
    %14 = vector.extract_strided_slice %5 {offsets = [96, 0], sizes = [32, 512], strides = [1, 1]} : vector<128x512xf32> to vector<32x512xf32>
    %15 = math.tanh %14 : vector<32x512xf32>
    %c0_6 = arith.constant 0 : index
    %c0_7 = arith.constant 0 : index
    %16 = vector.load %arg4[%c0_6, %c0_7] : memref<32x512xf32, #tpu.memory_space<vmem>>, vector<32x512xf32>
    %17 = arith.mulf %12, %16 : vector<32x512xf32>
    %18 = arith.mulf %11, %15 : vector<32x512xf32>
    %19 = arith.addf %17, %18 : vector<32x512xf32>
    %20 = math.tanh %19 : vector<32x512xf32>
    %21 = arith.mulf %13, %20 : vector<32x512xf32>
    %c0_8 = arith.constant 0 : index
    %c0_9 = arith.constant 0 : index
    %22 = vector.load %arg5[%c0_8, %c0_9] : memref<32x512xf32, #tpu.memory_space<vmem>>, vector<32x512xf32>
    tpu.vector_store %arg5[%c0_8, %c0_9], %21 {strides = array<i32>} : memref<32x512xf32, #tpu.memory_space<vmem>>, vector<32x512xf32>,
    %c0_10 = arith.constant 0 : index
    %c0_11 = arith.constant 0 : index
    %23 = vector.load %arg6[%c0_10, %c0_11] : memref<32x512xf32, #tpu.memory_space<vmem>>, vector<32x512xf32>
    tpu.vector_store %arg6[%c0_10, %c0_11], %19 {strides = array<i32>} : memref<32x512xf32, #tpu.memory_space<vmem>>, vector<32x512xf32>,
    return
  }
  func.func @transform_0(%arg0: i32) -> (i32, i32) {
    %c0_i32 = arith.constant 0 : i32
    %c0_i32_0 = arith.constant 0 : i32
    %c0_i32_1 = arith.constant 0 : i32
    return %c0_i32, %c0_i32_0 : i32, i32
  }
  func.func @transform_1(%arg0: i32) -> (i32, i32) {
    %c0_i32 = arith.constant 0 : i32
    %c0_i32_0 = arith.constant 0 : i32
    %c0_i32_1 = arith.constant 0 : i32
    return %c0_i32, %c0_i32_0 : i32, i32
  }
  func.func @transform_2(%arg0: i32) -> (i32, i32) {
    %c0_i32 = arith.constant 0 : i32
    %c0_i32_0 = arith.constant 0 : i32
    return %c0_i32, %arg0 : i32, i32
  }
  func.func @transform_3(%arg0: i32) -> (i32, i32) {
    %c0_i32 = arith.constant 0 : i32
    %c0_i32_0 = arith.constant 0 : i32
    return %c0_i32, %arg0 : i32, i32
  }
  func.func @transform_4(%arg0: i32) -> (i32, i32) {
    %c0_i32 = arith.constant 0 : i32
    %c0_i32_0 = arith.constant 0 : i32
    return %c0_i32, %arg0 : i32, i32
  }
  func.func @transform_5(%arg0: i32) -> (i32, i32) {
    %c0_i32 = arith.constant 0 : i32
    %c0_i32_0 = arith.constant 0 : i32
    return %c0_i32, %arg0 : i32, i32
  }
}

</mosaic_0001>

<bundles_post_ra>
// kernel: convlstm_cell_forward.1
= control target key start
LH: loop header
LB: loop body
LE: loop exit
PB: predicated region body
PF: predicated region fallthrough
CT: control target
= control target key end

     0   :  { %vm376_vm0 = vcmask 1043456   ;;  %v1835_v3 = vmov 0.0   ;;  %vm327_vm1 = vcmask 556032   ;;  %s3299_s2 = inlined_call_operand.vmem [shape: f32[324,512], index: 2, kind: input, shape index: {}]   ;;  %s3300_s0 = inlined_call_operand.vmem [shape: f32[128,324], index: 0, kind: input, shape index: {}]   ;;  %s3301_s1 = inlined_call_operand.vmem [shape: f32[128,1], index: 1, kind: input, shape index: {}]   ;;  %s3302_s3 = inlined_call_operand.vmem [shape: f32[32,512], index: 3, kind: input, shape index: {}]   ;;  %s3303_s5 = inlined_call_operand.vmem [shape: f32[32,512], index: 5, kind: output, shape index: {1}]   ;;  %s3304_s4 = inlined_call_operand.vmem [shape: f32[32,512], index: 4, kind: output, shape index: {0}]  }
   0x1   :  { %v128_v0 = vld [vmem:[%s3299_s2 + $0x1e8] sm:$0xff]  ;;  %v127_v2 = vld [vmem:[%s3299_s2 + $0x1e0] sm:$0xff]  ;;  %614 = vmatprep.mubr.f32.mxu1 %v1835_v3  ;;  %v1984_v38 = vld [vmem:[%s3300_s0 + $0x10] sm:$0xff] }
   0x2   :  { %v228_v1 = vld [vmem:[%s3299_s2 + $0x508] sm:$0xf]  ;;  %389 = vmatprep.subr.mxu0 %v128_v0  ;;  %v227_v4 = vld [vmem:[%s3299_s2 + $0x500] sm:$0xf]  ;;  %v130_v39 = vld [vmem:[%s3299_s2 + $0x1f8] sm:$0xff] }
   0x3   :  { %1473 = vmatprep.subr.msk.mxu1 %vm376_vm0, %v228_v1  ;;  %v124_v5 = vld [vmem:[%s3299_s2 + $0x1c8] sm:$0xff]  ;;  %390 = vmatpush1.msra.mxu0 %v127_v2  ;;  %v123_v7 = vld [vmem:[%s3299_s2 + $0x1c0] sm:$0xff]  ;;  %v129_v41 = vld [vmem:[%s3299_s2 + $0x1f0] sm:$0xff] }
   0x4   :  { %v224_v6 = vld [vmem:[%s3299_s2 + $0x4e8] sm:$0xff]  ;;  %1474 = vmatpush1.msk.msra.mxu1 %vm376_vm0, %v227_v4  ;;  %v223_v8 = vld [vmem:[%s3299_s2 + $0x4e0] sm:$0xff]  ;;  %391 = vmatprep.subr.mxu0 %v124_v5  ;;  %v126_v43 = vld [vmem:[%s3299_s2 + $0x1d8] sm:$0xff] }
   0x5   :  { %v120_v9 = vld [vmem:[%s3299_s2 + $0x1a8] sm:$0xff]  ;;  %566 = vmatprep.subr.mxu1 %v224_v6  ;;  %v119_v11 = vld [vmem:[%s3299_s2 + $0x1a0] sm:$0xff]  ;;  %392 = vmatpush1.msra.mxu0 %v123_v7  ;;  %v125_v45 = vld [vmem:[%s3299_s2 + $0x1d0] sm:$0xff] }
   0x6   :  { %v220_v10 = vld [vmem:[%s3299_s2 + $0x4c8] sm:$0xff]  ;;  %v219_v12 = vld [vmem:[%s3299_s2 + $0x4c0] sm:$0xff]  ;;  %567 = vmatpush1.msra.mxu1 %v223_v8  ;;  %393 = vmatprep.subr.mxu0 %v120_v9  ;;  %v122_v48 = vld [vmem:[%s3299_s2 + $0x1b8] sm:$0xff] }
   0x7   :  { %v116_v13 = vld [vmem:[%s3299_s2 + $0x188] sm:$0xff]  ;;  %568 = vmatprep.subr.mxu1 %v220_v10  ;;  %v115_v15 = vld [vmem:[%s3299_s2 + $0x180] sm:$0xff]  ;;  %394 = vmatpush1.msra.mxu0 %v119_v11  ;;  %v121_v50 = vld [vmem:[%s3299_s2 + $0x1b0] sm:$0xff] }
   0x8   :  { %v216_v14 = vld [vmem:[%s3299_s2 + $0x4a8] sm:$0xff]  ;;  %v215_v16 = vld [vmem:[%s3299_s2 + $0x4a0] sm:$0xff]  ;;  %569 = vmatpush1.msra.mxu1 %v219_v12  ;;  %395 = vmatprep.subr.mxu0 %v116_v13  ;;  %v118_v52 = vld [vmem:[%s3299_s2 + $0x198] sm:$0xff] }
   0x9   :  { %v112_v17 = vld [vmem:[%s3299_s2 + $0x168] sm:$0xff]  ;;  %570 = vmatprep.subr.mxu1 %v216_v14  ;;  %v111_v19 = vld [vmem:[%s3299_s2 + $0x160] sm:$0xff]  ;;  %396 = vmatpush1.msra.mxu0 %v115_v15  ;;  %v117_v54 = vld [vmem:[%s3299_s2 + $0x190] sm:$0xff] }
   0xa   :  { %v212_v18 = vld [vmem:[%s3299_s2 + $0x488] sm:$0xff]  ;;  %v211_v20 = vld [vmem:[%s3299_s2 + $0x480] sm:$0xff]  ;;  %571 = vmatpush1.msra.mxu1 %v215_v16  ;;  %397 = vmatprep.subr.mxu0 %v112_v17  ;;  %v114_v57 = vld [vmem:[%s3299_s2 + $0x178] sm:$0xff] }
   0xb   :  { %v108_v21 = vld [vmem:[%s3299_s2 + $0x148] sm:$0xff]  ;;  %572 = vmatprep.subr.mxu1 %v212_v18  ;;  %v107_v23 = vld [vmem:[%s3299_s2 + $0x140] sm:$0xff]  ;;  %398 = vmatpush1.msra.mxu0 %v111_v19  ;;  %v113_v59 = vld [vmem:[%s3299_s2 + $0x170] sm:$0xff] }
   0xc   :  { %v208_v22 = vld [vmem:[%s3299_s2 + $0x468] sm:$0xff]  ;;  %v207_v24 = vld [vmem:[%s3299_s2 + $0x460] sm:$0xff]  ;;  %573 = vmatpush1.msra.mxu1 %v211_v20  ;;  %399 = vmatprep.subr.mxu0 %v108_v21  ;;  %v110_v61 = vld [vmem:[%s3299_s2 + $0x158] sm:$0xff] }
   0xd   :  { %v104_v25 = vld [vmem:[%s3299_s2 + $0x128] sm:$0xff]  ;;  %574 = vmatprep.subr.mxu1 %v208_v22  ;;  %v103_v27 = vld [vmem:[%s3299_s2 + $0x120] sm:$0xff]  ;;  %400 = vmatpush1.msra.mxu0 %v107_v23  ;;  %v109_v63 = vld [vmem:[%s3299_s2 + $0x150] sm:$0xff] }
   0xe   :  { %v204_v26 = vld [vmem:[%s3299_s2 + $0x448] sm:$0xff]  ;;  %v203_v28 = vld [vmem:[%s3299_s2 + $0x440] sm:$0xff]  ;;  %575 = vmatpush1.msra.mxu1 %v207_v24  ;;  %401 = vmatprep.subr.mxu0 %v104_v25  ;;  %v2079_v1 = vld [vmem:[%s3300_s0 + $0x58] sm:$0xff] }
   0xf   :  { %v100_v29 = vld [vmem:[%s3299_s2 + $0x108] sm:$0xff]  ;;  %576 = vmatprep.subr.mxu1 %v204_v26  ;;  %v99_v31 = vld [vmem:[%s3299_s2 + $0x100] sm:$0xff]  ;;  %402 = vmatpush1.msra.mxu0 %v103_v27  ;;  %v106_v2 = vld [vmem:[%s3299_s2 + $0x138] sm:$0xff] }
  0x10   :  { %v200_v30 = vld [vmem:[%s3299_s2 + $0x428] sm:$0xff]  ;;  %v199_v32 = vld [vmem:[%s3299_s2 + $0x420] sm:$0xff]  ;;  %577 = vmatpush1.msra.mxu1 %v203_v28  ;;  %403 = vmatprep.subr.mxu0 %v100_v29  ;;  %v105_v5 = vld [vmem:[%s3299_s2 + $0x130] sm:$0xff] }
  0x11   :  { %v96_v33 = vld [vmem:[%s3299_s2 + $0xe8] sm:$0xff]  ;;  %578 = vmatprep.subr.mxu1 %v200_v30  ;;  %v95_v35 = vld [vmem:[%s3299_s2 + $0xe0] sm:$0xff]  ;;  %404 = vmatpush1.msra.mxu0 %v99_v31  ;;  %v102_v7 = vld [vmem:[%s3299_s2 + $0x118] sm:$0xff] }
  0x12   :  { %v196_v34 = vld [vmem:[%s3299_s2 + $0x408] sm:$0xff]  ;;  %v195_v36 = vld [vmem:[%s3299_s2 + $0x400] sm:$0xff]  ;;  %579 = vmatpush1.msra.mxu1 %v199_v32  ;;  %405 = vmatprep.subr.mxu0 %v96_v33  ;;  %v101_v9 = vld [vmem:[%s3299_s2 + $0x110] sm:$0xff] }
  0x13   :  { %v92_v37 = vld [vmem:[%s3299_s2 + $0xc8] sm:$0xff]  ;;  %580 = vmatprep.subr.mxu1 %v196_v34  ;;  %v91_v40 = vld [vmem:[%s3299_s2 + $0xc0] sm:$0xff]  ;;  %406 = vmatpush1.msra.mxu0 %v95_v35  ;;  %v2111_v11 = vld [vmem:[%s3300_s0 + $0x70] sm:$0xff] }
  0x14   :  { %581 = vmatpush1.msra.mxu1 %v195_v36  ;;  %v88_v42 = vld [vmem:[%s3299_s2 + $0xa8] sm:$0xff]  ;;  %407 = vmatprep.subr.mxu0 %v92_v37  ;;  %v87_v44 = vld [vmem:[%s3299_s2 + $0xa0] sm:$0xff]  ;;  %v98_v12 = vld [vmem:[%s3299_s2 + $0xf8] sm:$0xff] }
  0x15   :  { %1475 = vmatmul.mubr.msk.f32.vlgmr.msra.gmra.mxu1 %vm327_vm1, %v1984_v38  ;;  %711 = vmatprep.subr.mxu1 %v130_v39  ;;  %v84_v46 = vld [vmem:[%s3299_s2 + $0x88] sm:$0xff]  ;;  %v83_v49 = vld [vmem:[%s3299_s2 + $0x80] sm:$0xff]  ;;  %v97_v14 = vld [vmem:[%s3299_s2 + $0xf0] sm:$0xff] }
  0x16   :  { %408 = vmatpush1.msra.mxu0 %v91_v40  ;;  %712 = vmatpush1.msra.mxu1 %v129_v41  ;;  %v2015_v47 = vld [vmem:[%s3300_s0 + $0x28] sm:$0xff]  ;;  %v79_v53 = vld [vmem:[%s3299_s2 + $0x60] sm:$0xff]  ;;  %v94_v16 = vld [vmem:[%s3299_s2 + $0xd8] sm:$0xff] }
  0x17   :  { %409 = vmatprep.subr.mxu0 %v88_v42  ;;  %713 = vmatprep.subr.mxu1 %v126_v43  ;;  %v80_v51 = vld [vmem:[%s3299_s2 + $0x68] sm:$0xff]  ;;  %v2047_v56 = vld [vmem:[%s3300_s0 + $0x40] sm:$0xff]  ;;  %v93_v18 = vld [vmem:[%s3299_s2 + $0xd0] sm:$0xff] }
  0x18   :  { %410 = vmatpush1.msra.mxu0 %v87_v44  ;;  %620 = vmatprep.mubr.f32.mxu1 %v1835_v3  ;;  %v76_v55 = vld [vmem:[%s3299_s2 + $0x48] sm:$0xff]  ;;  %v75_v58 = vld [vmem:[%s3299_s2 + $0x40] sm:$0xff]  ;;  %v90_v21 = vld [vmem:[%s3299_s2 + $0xb8] sm:$0xff] }
  0x19   :  { %714 = vmatpush1.msra.mxu1 %v125_v45  ;;  %411 = vmatprep.subr.mxu0 %v84_v46  ;;  %v72_v60 = vld [vmem:[%s3299_s2 + $0x28] sm:$0xff]  ;;  %v71_v62 = vld [vmem:[%s3299_s2 + $0x20] sm:$0xff]  ;;  %v89_v23 = vld [vmem:[%s3299_s2 + $0xb0] sm:$0xff] }
  0x1a   :  { %1476 = vmatmul.mubr.msk.f32.gmra.mxu1 %vm327_vm1, %v2015_v47  ;;  %715 = vmatprep.subr.mxu1 %v122_v48  ;;  %v68_v0 = vld [vmem:[%s3299_s2 + $0x8] sm:$0xff]  ;;  %v67_v4 = vld [vmem:[%s3299_s2] sm:$0xff]  ;;  %v86_v25 = vld [vmem:[%s3299_s2 + $0x98] sm:$0xff] }
  0x1b   :  { %412 = vmatpush1.msra.mxu0 %v83_v49  ;;  %716 = vmatpush1.msra.mxu1 %v121_v50  ;;  %v192_v6 = vld [vmem:[%s3299_s2 + $0x3e8] sm:$0xff]  ;;  %v191_v8 = vld [vmem:[%s3299_s2 + $0x3e0] sm:$0xff]  ;;  %v85_v27 = vld [vmem:[%s3299_s2 + $0x90] sm:$0xff] }
  0x1c   :  { %413 = vmatprep.subr.mxu0 %v80_v51  ;;  %717 = vmatprep.subr.mxu1 %v118_v52  ;;  %v188_v10 = vld [vmem:[%s3299_s2 + $0x3c8] sm:$0xff]  ;;  %v187_v13 = vld [vmem:[%s3299_s2 + $0x3c0] sm:$0xff]  ;;  %v82_v30 = vld [vmem:[%s3299_s2 + $0x78] sm:$0xff] }
  0x1d   :  { %414 = vmatpush1.msra.mxu0 %v79_v53  ;;  %626 = vmatprep.mubr.f32.mxu1 %v1835_v3  ;;  %v184_v15 = vld [vmem:[%s3299_s2 + $0x3a8] sm:$0xff]  ;;  %v183_v17 = vld [vmem:[%s3299_s2 + $0x3a0] sm:$0xff]  ;;  %v81_v32 = vld [vmem:[%s3299_s2 + $0x70] sm:$0xff] }
  0x1e   :  { %718 = vmatpush1.msra.mxu1 %v117_v54  ;;  %415 = vmatprep.subr.mxu0 %v76_v55  ;;  %v180_v19 = vld [vmem:[%s3299_s2 + $0x388] sm:$0xff]  ;;  %v179_v22 = vld [vmem:[%s3299_s2 + $0x380] sm:$0xff]  ;;  %v78_v34 = vld [vmem:[%s3299_s2 + $0x58] sm:$0xff] }
  0x1f   :  { %1477 = vmatmul.mubr.msk.f32.gmra.mxu1 %vm327_vm1, %v2047_v56  ;;  %719 = vmatprep.subr.mxu1 %v114_v57  ;;  %v2143_v20 = vld [vmem:[%s3300_s0 + $0x88] sm:$0xff]  ;;  %v175_v26 = vld [vmem:[%s3299_s2 + $0x360] sm:$0xff]  ;;  %v77_v36 = vld [vmem:[%s3299_s2 + $0x50] sm:$0xff] }
  0x20   :  { %416 = vmatpush1.msra.mxu0 %v75_v58  ;;  %720 = vmatpush1.msra.mxu1 %v113_v59  ;;  %v176_v24 = vld [vmem:[%s3299_s2 + $0x368] sm:$0xff]  ;;  %v2175_v29 = vld [vmem:[%s3300_s0 + $0xa0] sm:$0xff]  ;;  %v2207_v39 = vld [vmem:[%s3300_s0 + $0xb8] sm:$0xff] }
  0x21   :  { %417 = vmatprep.subr.mxu0 %v72_v60  ;;  %721 = vmatprep.subr.mxu1 %v110_v61  ;;  %v172_v28 = vld [vmem:[%s3299_s2 + $0x348] sm:$0xff]  ;;  %v171_v31 = vld [vmem:[%s3299_s2 + $0x340] sm:$0xff]  ;;  %v74_v40 = vld [vmem:[%s3299_s2 + $0x38] sm:$0xff] }
  0x22   :  { %418 = vmatpush1.msra.mxu0 %v71_v62  ;;  %632 = vmatprep.mubr.f32.mxu1 %v1835_v3  ;;  %v168_v33 = vld [vmem:[%s3299_s2 + $0x328] sm:$0xff]  ;;  %v167_v35 = vld [vmem:[%s3299_s2 + $0x320] sm:$0xff]  ;;  %v73_v42 = vld [vmem:[%s3299_s2 + $0x30] sm:$0xff] }
  0x23   :  { %722 = vmatpush1.msra.mxu1 %v109_v63  ;;  %419 = vmatprep.subr.mxu0 %v68_v0  ;;  %v164_v37 = vld [vmem:[%s3299_s2 + $0x308] sm:$0xff]  ;;  %v163_v41 = vld [vmem:[%s3299_s2 + $0x300] sm:$0xff]  ;;  %v70_v44 = vld [vmem:[%s3299_s2 + $0x18] sm:$0xff] }
  0x24   :  { %1478 = vmatmul.mubr.msk.f32.gmra.mxu1 %vm327_vm1, %v2079_v1  ;;  %723 = vmatprep.subr.mxu1 %v106_v2  ;;  %v160_v43 = vld [vmem:[%s3299_s2 + $0x2e8] sm:$0xff]  ;;  %v159_v45 = vld [vmem:[%s3299_s2 + $0x2e0] sm:$0xff]  ;;  %v69_v46 = vld [vmem:[%s3299_s2 + $0x10] sm:$0xff] }
  0x25   :  { %420 = vmatpush1.msra.mxu0 %v67_v4  ;;  %724 = vmatpush1.msra.mxu1 %v105_v5  ;;  %v156_v48 = vld [vmem:[%s3299_s2 + $0x2c8] sm:$0xff]  ;;  %v2239_v49 = vld [vmem:[%s3300_s0 + $0xd0] sm:$0xff]  ;;  %v194_v50 = vld [vmem:[%s3299_s2 + $0x3f8] sm:$0xff] }
  0x26   :  { %421 = vmatprep.subr.mxu0 %v192_v6  ;;  %725 = vmatprep.subr.mxu1 %v102_v7  ;;  %v155_v51 = vld [vmem:[%s3299_s2 + $0x2c0] sm:$0xff]  ;;  %v193_v52 = vld [vmem:[%s3299_s2 + $0x3f0] sm:$0xff]  ;;  %v152_v53 = vld [vmem:[%s3299_s2 + $0x2a8] sm:$0xff] }
  0x27   :  { %422 = vmatpush2.msra.mxu0 %v191_v8  ;;  %638 = vmatprep.mubr.f32.mxu1 %v1835_v3  ;;  %v190_v54 = vld [vmem:[%s3299_s2 + $0x3d8] sm:$0xff]  ;;  %v151_v55 = vld [vmem:[%s3299_s2 + $0x2a0] sm:$0xff]  ;;  %v189_v57 = vld [vmem:[%s3299_s2 + $0x3d0] sm:$0xff] }
  0x28   :  { %726 = vmatpush1.msra.mxu1 %v101_v9  ;;  %423 = vmatprep.subr.mxu0 %v188_v10  ;;  %v148_v58 = vld [vmem:[%s3299_s2 + $0x288] sm:$0xff]  ;;  %v186_v60 = vld [vmem:[%s3299_s2 + $0x3b8] sm:$0xff]  ;;  %v147_v61 = vld [vmem:[%s3299_s2 + $0x280] sm:$0xff] }
  0x29   :  { %1479 = vmatmul.mubr.msk.f32.gmra.mxu1 %vm327_vm1, %v2111_v11  ;;  %727 = vmatprep.subr.mxu1 %v98_v12  ;;  %v2271_v59 = vld [vmem:[%s3300_s0 + $0xe8] sm:$0xff]  ;;  %v185_v62 = vld [vmem:[%s3299_s2 + $0x3b0] sm:$0xff]  ;;  %v182_v0 = vld [vmem:[%s3299_s2 + $0x398] sm:$0xff] }
  0x2a   :  { %424 = vmatpush2.msra.mxu0 %v187_v13  ;;  %728 = vmatpush1.msra.mxu1 %v97_v14  ;;  %v144_v63 = vld [vmem:[%s3299_s2 + $0x268] sm:$0xff]  ;;  %v143_v2 = vld [vmem:[%s3299_s2 + $0x260] sm:$0xff]  ;;  %v181_v4 = vld [vmem:[%s3299_s2 + $0x390] sm:$0xff] }
  0x2b   :  { %425 = vmatprep.subr.mxu0 %v184_v15  ;;  %729 = vmatprep.subr.mxu1 %v94_v16  ;;  %v140_v5 = vld [vmem:[%s3299_s2 + $0x248] sm:$0xff]  ;;  %v2303_v6 = vld [vmem:[%s3300_s0 + $0x100] sm:$0xff]  ;;  %v178_v7 = vld [vmem:[%s3299_s2 + $0x378] sm:$0xff] }
  0x2c   :  { %426 = vmatpush2.msra.mxu0 %v183_v17  ;;  %644 = vmatprep.mubr.f32.mxu1 %v1835_v3  ;;  %v139_v8 = vld [vmem:[%s3299_s2 + $0x240] sm:$0xff]  ;;  %v177_v9 = vld [vmem:[%s3299_s2 + $0x370] sm:$0xff]  ;;  %v136_v10 = vld [vmem:[%s3299_s2 + $0x228] sm:$0xff] }
  0x2d   :  { %730 = vmatpush1.msra.mxu1 %v93_v18  ;;  %427 = vmatprep.subr.mxu0 %v180_v19  ;;  %v174_v12 = vld [vmem:[%s3299_s2 + $0x358] sm:$0xff]  ;;  %v135_v13 = vld [vmem:[%s3299_s2 + $0x220] sm:$0xff]  ;;  %v173_v14 = vld [vmem:[%s3299_s2 + $0x350] sm:$0xff] }
  0x2e   :  { %1480 = vmatmul.mubr.msk.f32.gmra.mxu1 %vm327_vm1, %v2143_v20  ;;  %731 = vmatprep.subr.mxu1 %v90_v21  ;;  %v132_v15 = vld [vmem:[%s3299_s2 + $0x208] sm:$0xff]  ;;  %v2335_v16 = vld [vmem:[%s3300_s0 + $0x118] sm:$0xff]  ;;  %v131_v18 = vld [vmem:[%s3299_s2 + $0x200] sm:$0xff] }
  0x2f   :  { %428 = vmatpush2.msra.mxu0 %v179_v22  ;;  %732 = vmatpush1.msra.mxu1 %v89_v23  ;;  %v170_v17 = vld [vmem:[%s3299_s2 + $0x338] sm:$0xff]  ;;  %v2347_v19 = vld [vmem:[%s3300_s0 + $0x8] sm:$0xff]  ;;  %v169_v21 = vld [vmem:[%s3299_s2 + $0x330] sm:$0xff] }
  0x30   :  { %429 = vmatprep.subr.mxu0 %v176_v24  ;;  %733 = vmatprep.subr.mxu1 %v86_v25  ;;  %v2357_v22 = vld [vmem:[%s3300_s0] sm:$0xff]  ;;  %v166_v23 = vld [vmem:[%s3299_s2 + $0x318] sm:$0xff]  ;;  %v165_v25 = vld [vmem:[%s3299_s2 + $0x310] sm:$0xff] }
  0x31   :  { %430 = vmatpush2.msra.mxu0 %v175_v26  ;;  %650 = vmatprep.mubr.f32.mxu1 %v1835_v3  ;;  %v2365_v24 = vld [vmem:[%s3299_s2 + $0x518] sm:$0xf]  ;;  %v2374_v26 = vld [vmem:[%s3299_s2 + $0x510] sm:$0xf] }
  0x32   :  { %734 = vmatpush1.msra.mxu1 %v85_v27  ;;  %431 = vmatprep.subr.mxu0 %v172_v28  ;;  %v2380_v27 = vld [vmem:[%s3300_s0 + $0x130] sm:$0xff]  ;;  %v162_v28 = vld [vmem:[%s3299_s2 + $0x2f8] sm:$0xff] }
  0x33   :  { %1481 = vmatmul.mubr.msk.f32.gmra.mxu1 %vm327_vm1, %v2175_v29  ;;  %735 = vmatprep.subr.mxu1 %v82_v30  ;;  %v2391_v30 = vld [vmem:[%s3300_s0 + $0x20] sm:$0xff] }
  0x34   :  { %432 = vmatpush2.msra.mxu0 %v171_v31  ;;  %736 = vmatpush1.msra.mxu1 %v81_v32  ;;  %v161_v31 = vld [vmem:[%s3299_s2 + $0x2f0] sm:$0xff]  ;;  %v2401_v32 = vld [vmem:[%s3300_s0 + $0x18] sm:$0xff] }
  0x35   :  { %433 = vmatprep.subr.mxu0 %v168_v33  ;;  %737 = vmatprep.subr.mxu1 %v78_v34  ;;  %v158_v33 = vld [vmem:[%s3299_s2 + $0x2d8] sm:$0xff]  ;;  %v157_v34 = vld [vmem:[%s3299_s2 + $0x2d0] sm:$0xff] }
  0x36   :  { %434 = vmatpush2.msra.mxu0 %v167_v35  ;;  %656 = vmatprep.mubr.f32.mxu1 %v1835_v3  ;;  %v2415_v35 = vld [vmem:[%s3300_s0 + $0x148] sm:$0xff] }
  0x37   :  { %738 = vmatpush1.msra.mxu1 %v77_v36  ;;  %435 = vmatprep.subr.mxu0 %v164_v37  ;;  %v154_v36 = vld [vmem:[%s3299_s2 + $0x2b8] sm:$0xff] }
  0x38   :  { %1482 = vmatmul.mubr.msk.f32.gmra.mxu1 %vm327_vm1, %v2207_v39  ;;  %739 = vmatprep.subr.mxu1 %v74_v40  ;;  %v2424_v37 = vld [vmem:[%s3300_s0 + $0x38] sm:$0xff]  ;;  %v153_v40 = vld [vmem:[%s3299_s2 + $0x2b0] sm:$0xff] }
  0x39   :  { %436 = vmatpush2.msra.mxu0 %v163_v41  ;;  %740 = vmatpush1.msra.mxu1 %v73_v42  ;;  %v2433_v41 = vld [vmem:[%s3300_s0 + $0x30] sm:$0xff]  ;;  %v150_v42 = vld [vmem:[%s3299_s2 + $0x298] sm:$0xff] }
  0x3a   :  { %437 = vmatprep.subr.mxu0 %v160_v43  ;;  %741 = vmatprep.subr.mxu1 %v70_v44  ;;  %v2443_v43 = vld [vmem:[%s3299_s2 + $0x4f8] sm:$0xff]  ;;  %v149_v44 = vld [vmem:[%s3299_s2 + $0x290] sm:$0xff] }
  0x3b   :  { %438 = vmatpush2.msra.mxu0 %v159_v45  ;;  %662 = vmatprep.mubr.f32.mxu1 %v1835_v3  ;;  %v2452_v45 = vld [vmem:[%s3299_s2 + $0x4f0] sm:$0xff] }
  0x3c   :  { %742 = vmatpush1.msra.mxu1 %v69_v46  ;;  %439 = vmatprep.subr.mxu0 %v156_v48  ;;  %v2458_v46 = vld [vmem:[%s3300_s0 + $0x160] sm:$0xff]  ;;  %v146_v48 = vld [vmem:[%s3299_s2 + $0x278] sm:$0xff] }
  0x3d   :  { %1483 = vmatmul.mubr.msk.f32.gmra.mxu1 %vm327_vm1, %v2239_v49  ;;  %743 = vmatprep.subr.mxu1 %v194_v50  ;;  %v2468_v50 = vld [vmem:[%s3300_s0 + $0x50] sm:$0xff] }
  0x3e   :  { %440 = vmatpush2.msra.mxu0 %v155_v51  ;;  %744 = vmatpush2.msra.mxu1 %v193_v52  ;;  %v145_v51 = vld [vmem:[%s3299_s2 + $0x270] sm:$0xff]  ;;  %v2477_v52 = vld [vmem:[%s3300_s0 + $0x48] sm:$0xff] }
  0x3f   :  { %441 = vmatprep.subr.mxu0 %v152_v53  ;;  %745 = vmatprep.subr.mxu1 %v190_v54  ;;  %v142_v53 = vld [vmem:[%s3299_s2 + $0x258] sm:$0xff]  ;;  %v141_v54 = vld [vmem:[%s3299_s2 + $0x250] sm:$0xff] }
  0x40   :  { %442 = vmatpush2.msra.mxu0 %v151_v55  ;;  %668 = vmatprep.mubr.f32.mxu1 %v1835_v3  ;;  %v2491_v55 = vld [vmem:[%s3300_s0 + $0x178] sm:$0xff] }
  0x41   :  { %746 = vmatpush2.msra.mxu1 %v189_v57  ;;  %443 = vmatprep.subr.mxu0 %v148_v58  ;;  %v138_v57 = vld [vmem:[%s3299_s2 + $0x238] sm:$0xff]  ;;  %v2500_v58 = vld [vmem:[%s3300_s0 + $0x68] sm:$0xff] }
  0x42   :  { %1484 = vmatmul.mubr.msk.f32.gmra.mxu1 %vm327_vm1, %v2271_v59  ;;  %747 = vmatprep.subr.mxu1 %v186_v60  ;;  %v137_v60 = vld [vmem:[%s3299_s2 + $0x230] sm:$0xff] }
  0x43   :  { %444 = vmatpush2.msra.mxu0 %v147_v61  ;;  %748 = vmatpush2.msra.mxu1 %v185_v62  ;;  %v2509_v61 = vld [vmem:[%s3299_s2 + $0x4d8] sm:$0xff]  ;;  %v2514_v62 = vld [vmem:[%s3300_s0 + $0x60] sm:$0xff] }
  0x44   :  { %445 = vmatprep.subr.mxu0 %v144_v63  ;;  %749 = vmatprep.subr.mxu1 %v182_v0  ;;  %v134_v63 = vld [vmem:[%s3299_s2 + $0x218] sm:$0xff]  ;;  %v221_v0 = vld [vmem:[%s3299_s2 + $0x4d0] sm:$0xff] }
  0x45   :  { %446 = vmatpush2.msra.mxu0 %v143_v2  ;;  %674 = vmatprep.mubr.f32.mxu1 %v1835_v3  ;;  %v133_v2 = vld [vmem:[%s3299_s2 + $0x210] sm:$0xff] }
  0x46   :  { %750 = vmatpush2.msra.mxu1 %v181_v4  ;;  %447 = vmatprep.subr.mxu0 %v140_v5  ;;  %v35_v4 = vld [vmem:[%s3300_s0 + $0x80] sm:$0xff]  ;;  %v2536_v5 = vld [vmem:[%s3300_s0 + $0x78] sm:$0xff] }
  0x47   :  { %1485 = vmatmul.mubr.msk.f32.gmra.mxu1 %vm327_vm1, %v2303_v6  ;;  %751 = vmatprep.subr.mxu1 %v178_v7  ;;  %v218_v7 = vld [vmem:[%s3299_s2 + $0x4b8] sm:$0xff] }
  0x48   :  { %448 = vmatpush2.msra.mxu0 %v139_v8  ;;  %752 = vmatpush2.msra.mxu1 %v177_v9  ;;  %v2545_v8 = vld [vmem:[%s3300_s0 + $0x98] sm:$0xff]  ;;  %v217_v9 = vld [vmem:[%s3299_s2 + $0x4b0] sm:$0xff] }
  0x49   :  { %449 = vmatprep.subr.mxu0 %v136_v10  ;;  %753 = vmatprep.subr.mxu1 %v174_v12  ;;  %v214_v10 = vld [vmem:[%s3299_s2 + $0x498] sm:$0xff]  ;;  %v2560_v12 = vld [vmem:[%s3300_s0 + $0x90] sm:$0xff] }
  0x4a   :  { %450 = vmatpush2.msra.mxu0 %v135_v13  ;;  %680 = vmatprep.mubr.f32.mxu1 %v1835_v3  ;;  %v2565_v13 = vld [vmem:[%s3300_s0 + $0xb0] sm:$0xff] }
  0x4b   :  { %754 = vmatpush2.msra.mxu1 %v173_v14  ;;  %451 = vmatprep.subr.mxu0 %v132_v15  ;;  %v213_v14 = vld [vmem:[%s3299_s2 + $0x490] sm:$0xff]  ;;  %v210_v15 = vld [vmem:[%s3299_s2 + $0x478] sm:$0xff] }
  0x4c   :  { %1486 = vmatmul.mubr.msk.f32.gmra.mxu1 %vm327_vm1, %v2335_v16  ;;  %755 = vmatprep.subr.mxu1 %v170_v17  ;;  %v209_v17 = vld [vmem:[%s3299_s2 + $0x470] sm:$0xff] }
  0x4d   :  { %452 = vmatpush2.msra.mxu0 %v131_v18  ;;  %453 = vmatprep.mubr.f32.mxu0 %v2347_v19  ;;  %v2585_v18 = vld [vmem:[%s3300_s0 + $0xa8] sm:$0xff] }
  0x4e   :  { %756 = vmatpush2.msra.mxu1 %v169_v21  ;;  %454 = vmatmul.mubr.f32.vlgmr.msra.gmra.mxu0 %v2357_v22  ;;  %v206_v21 = vld [vmem:[%s3299_s2 + $0x458] sm:$0xff] }
  0x4f   :  { %757 = vmatprep.subr.mxu1 %v166_v23  ;;  %1491 = vmatprep.subr.msk.mxu0 %vm376_vm0, %v2365_v24  ;;  %v2607_v23 = vld [vmem:[%s3300_s0 + $0xc0] sm:$0xff] }
  0x50   :  { %686 = vmatprep.mubr.f32.mxu1 %v1835_v3  ;;  %758 = vmatpush2.msra.mxu1 %v165_v25  ;;  %v202_v25 = vld [vmem:[%s3299_s2 + $0x438] sm:$0xff] }
  0x51   :  { %1492 = vmatpush1.msk.msra.mxu0 %vm376_vm0, %v2374_v26  ;;  %1487 = vmatmul.mubr.msk.f32.gmra.mxu1 %vm327_vm1, %v2380_v27 }
  0x52   :  { %759 = vmatprep.subr.mxu1 %v162_v28  ;;  %459 = vmatprep.mubr.f32.mxu0 %v2391_v30  ;;  %v2629_v28 = vld [vmem:[%s3300_s0 + $0xd8] sm:$0xff] }
  0x53   :  { %760 = vmatpush2.msra.mxu1 %v161_v31  ;;  %460 = vmatmul.mubr.f32.gmra.mxu0 %v2401_v32  ;;  %v198_v31 = vld [vmem:[%s3299_s2 + $0x418] sm:$0xff] }
  0x54   :  { %761 = vmatprep.subr.mxu1 %v158_v33  ;;  %692 = vmatprep.mubr.f32.mxu1 %v1835_v3  ;;  %v49_v33 = vld [vmem:[%s3300_s0 + $0xf0] sm:$0xff] }
  0x55   :  { %762 = vmatpush2.msra.mxu1 %v157_v34  ;;  %465 = vmatprep.mubr.f32.mxu0 %v2424_v37  ;;  %v2652_v34 = vld [vmem:[%s3300_s0 + $0x110] sm:$0xff] }
  0x56   :  { %1488 = vmatmul.mubr.msk.f32.gmra.mxu1 %vm327_vm1, %v2415_v35  ;;  %763 = vmatprep.subr.mxu1 %v154_v36  ;;  %v52_v36 = vld [vmem:[%s3300_s0 + $0x108] sm:$0xff] }
  0x57   :  { %764 = vmatpush2.msra.mxu1 %v153_v40  ;;  %466 = vmatmul.mubr.f32.gmra.mxu0 %v2433_v41  ;;  %v1836_v40 = vmov 0  }
  0x58   :  { %765 = vmatprep.subr.mxu1 %v150_v42  ;;  %888 = vmatprep.subr.mxu0 %v2443_v43  ;;  %v55_v42 = vld [vmem:[%s3300_s0 + $0x120] sm:$0xff] }
  0x59   :  { %698 = vmatprep.mubr.f32.mxu1 %v1835_v3  ;;  %766 = vmatpush2.msra.mxu1 %v149_v44  ;;  %v232_v44 = vld [vmem:[%s3301_s1 + $0x8] sm:$0xff] }
  0x5a   :  { %889 = vmatpush1.msra.mxu0 %v2452_v45  ;;  %1489 = vmatmul.mubr.msk.f32.gmra.mxu1 %vm327_vm1, %v2458_v46 }
  0x5b   :  { %767 = vmatprep.subr.mxu1 %v146_v48  ;;  %471 = vmatprep.mubr.f32.mxu0 %v2468_v50  ;;  %v58_v48 = vld [vmem:[%s3300_s0 + $0x138] sm:$0xff] }
  0x5c   :  { %768 = vmatpush2.msra.mxu1 %v145_v51  ;;  %472 = vmatmul.mubr.f32.gmra.mxu0 %v2477_v52  ;;  %v234_v51 = vld [vmem:[%s3301_s1 + $0x18] sm:$0xff] }
  0x5d   :  { %769 = vmatprep.subr.mxu1 %v142_v53  ;;  %704 = vmatprep.mubr.f32.mxu1 %v1835_v3  ;;  %v61_v53 = vld [vmem:[%s3300_s0 + $0x150] sm:$0xff] }
  0x5e   :  { %770 = vmatpush2.msra.mxu1 %v141_v54  ;;  %477 = vmatprep.mubr.f32.mxu0 %v2500_v58  ;;  %v65_v54 = vld [vmem:[%s3300_s0 + $0x170] sm:$0xff] }
  0x5f   :  { %1490 = vmatmul.mubr.msk.f32.gmra.mxu1 %vm327_vm1, %v2491_v55  ;;  %771 = vmatprep.subr.mxu1 %v138_v57  ;;  %v236_v57 = vld [vmem:[%s3301_s1 + $0x28] sm:$0xff] }
  0x60   :  { %772 = vmatpush2.msra.mxu1 %v137_v60  ;;  %890 = vmatprep.subr.mxu0 %v2509_v61  ;;  %v64_v60 = vld [vmem:[%s3300_s0 + $0x168] sm:$0xff] }
  0x61   :  { %478 = vmatmul.mubr.f32.gmra.mxu0 %v2514_v62  ;;  %773 = vmatprep.subr.mxu1 %v134_v63  ;;  %v240_v63 = vld [vmem:[%s3301_s1 + $0x48] sm:$0xff] }
  0x62   :  { %891 = vmatpush1.msra.mxu0 %v221_v0  ;;  %774 = vmatpush2.msra.mxu1 %v133_v2  ;;  %v242_v2 = vld [vmem:[%s3301_s1 + $0x58] sm:$0xff] }
  0x63   :  { %775 = vmatprep.mubr.f32.mxu1 %v2347_v19  ;;  %483 = vmatprep.mubr.f32.mxu0 %v35_v4  ;;  %v2590_v19 = vld [vmem:[%s3300_s0 + $0xc8] sm:$0xff] }
  0x64   :  { %776 = vmatmul.mubr.f32.vlgmr.msra.gmra.mxu1 %v2357_v22  ;;  %892 = vmatprep.subr.mxu0 %v218_v7  ;;  %v205_v22 = vld [vmem:[%s3299_s2 + $0x450] sm:$0xff] }
  0x65   :  { %484 = vmatmul.mubr.f32.gmra.mxu0 %v2536_v5  ;;  %781 = vmatprep.mubr.f32.mxu1 %v2391_v30  ;;  %v2635_v30 = vld [vmem:[%s3300_s0 + $0xf8] sm:$0xff] }
  0x66   :  { %489 = vmatprep.mubr.f32.mxu0 %v2545_v8  ;;  %893 = vmatpush1.msra.mxu0 %v217_v9 }
  0x67   :  { %1557 = vmatprep.subr.msk.mxu1 %vm376_vm0, %v2365_v24  ;;  %894 = vmatprep.subr.mxu0 %v214_v10  ;;  %v2613_v24 = vld [vmem:[%s3300_s0 + $0xe0] sm:$0xff] }
  0x68   :  { %782 = vmatmul.mubr.f32.gmra.mxu1 %v2401_v32  ;;  %895 = vmatpush1.msra.mxu0 %v213_v14  ;;  %v197_v32 = vld [vmem:[%s3299_s2 + $0x410] sm:$0xff] }
  0x69   :  { %490 = vmatmul.mubr.f32.gmra.mxu0 %v2560_v12  ;;  %787 = vmatprep.mubr.f32.mxu1 %v2424_v37  ;;  %v56_v37 = vld [vmem:[%s3300_s0 + $0x128] sm:$0xff] }
  0x6a   :  { %495 = vmatprep.mubr.f32.mxu0 %v2565_v13  ;;  %1566 = vmatpush1.msk.msra.mxu1 %vm376_vm0, %v2374_v26  ;;  %v201_v26 = vld [vmem:[%s3299_s2 + $0x430] sm:$0xff] }
  0x6b   :  { %896 = vmatprep.subr.mxu0 %v210_v15  ;;  %1558 = vmatprep.subr.mxu1 %v2443_v43  ;;  %v59_v43 = vld [vmem:[%s3300_s0 + $0x140] sm:$0xff] }
  0x6c   :  { %788 = vmatmul.mubr.f32.gmra.mxu1 %v2433_v41  ;;  %897 = vmatpush1.msra.mxu0 %v209_v17  ;;  %v231_v41 = vld [vmem:[%s3301_s1] sm:$0xff] }
  0x6d   :  { %496 = vmatmul.mubr.f32.gmra.mxu0 %v2585_v18  ;;  %793 = vmatprep.mubr.f32.mxu1 %v2468_v50  ;;  %v62_v50 = vld [vmem:[%s3300_s0 + $0x158] sm:$0xff] }
  0x6e   :  { %501 = vmatprep.mubr.f32.mxu0 %v2590_v19  ;;  %1567 = vmatpush1.msra.mxu1 %v2452_v45  ;;  %v233_v45 = vld [vmem:[%s3301_s1 + $0x10] sm:$0xff] }
  0x6f   :  { %898 = vmatprep.subr.mxu0 %v206_v21  ;;  %1559 = vmatprep.subr.mxu1 %v2509_v61  ;;  %v238_v61 = vld [vmem:[%s3301_s1 + $0x38] sm:$0xff] }
  0x70   :  { %794 = vmatmul.mubr.f32.gmra.mxu1 %v2477_v52  ;;  %899 = vmatpush1.msra.mxu0 %v205_v22  ;;  %v235_v52 = vld [vmem:[%s3301_s1 + $0x20] sm:$0xff] }
  0x71   :  { %502 = vmatmul.mubr.f32.gmra.mxu0 %v2607_v23  ;;  %799 = vmatprep.mubr.f32.mxu1 %v2500_v58  ;;  %v237_v58 = vld [vmem:[%s3301_s1 + $0x30] sm:$0xff] }
  0x72   :  { %507 = vmatprep.mubr.f32.mxu0 %v2613_v24  ;;  %1568 = vmatpush1.msra.mxu1 %v221_v0  ;;  %v241_v0 = vld [vmem:[%s3301_s1 + $0x50] sm:$0xff] }
  0x73   :  { %900 = vmatprep.subr.mxu0 %v202_v25  ;;  %1560 = vmatprep.subr.mxu1 %v218_v7 }
  0x74   :  { %800 = vmatmul.mubr.f32.gmra.mxu1 %v2514_v62  ;;  %901 = vmatpush1.msra.mxu0 %v201_v26  ;;  %v239_v62 = vld [vmem:[%s3301_s1 + $0x40] sm:$0xff] }
  0x75   :  { %508 = vmatmul.mubr.f32.gmra.mxu0 %v2629_v28  ;;  %805 = vmatprep.mubr.f32.mxu1 %v35_v4  ;;  %v244_v4 = vld [vmem:[%s3301_s1 + $0x68] sm:$0xff] }
  0x76   :  { %513 = vmatprep.mubr.f32.mxu0 %v2635_v30  ;;  %1569 = vmatpush1.msra.mxu1 %v217_v9 }
  0x77   :  { %902 = vmatprep.subr.mxu0 %v198_v31  ;;  %1561 = vmatprep.subr.mxu1 %v214_v10 }
  0x78   :  { %806 = vmatmul.mubr.f32.gmra.mxu1 %v2536_v5  ;;  %903 = vmatpush1.msra.mxu0 %v197_v32  ;;  %v246_v5 = vld [vmem:[%s3301_s1 + $0x78] sm:$0xff] }
  0x79   :  { %514 = vmatmul.mubr.f32.gmra.mxu0 %v49_v33  ;;  %811 = vmatprep.mubr.f32.mxu1 %v2545_v8 }
  0x7a   :  { %519 = vmatprep.mubr.f32.mxu0 %v2652_v34  ;;  %1570 = vmatpush1.msra.mxu1 %v213_v14 }
  0x7b   :  { %1577 = vset.pattern.permute.xlu0 %v1836_v40  ;;  %1562 = vmatprep.subr.mxu1 %v210_v15 }
  0x7c   :  { %812 = vmatmul.mubr.f32.gmra.mxu1 %v2560_v12  ;;  %249 = vperm.xlu0 %1577, %v231_v41  }
  0x7d   :  { %520 = vmatmul.mubr.f32.gmra.mxu0 %v52_v36  ;;  %817 = vmatprep.mubr.f32.mxu1 %v2565_v13 }
  0x7e   :  { %525 = vmatprep.mubr.f32.mxu0 %v56_v37  ;;  %1571 = vmatpush1.msra.mxu1 %v209_v17 }
  0x7f   :  { %1563 = vmatprep.subr.mxu1 %v206_v21  ;;  %1578 = vset.pattern.permute.xlu1 %v1836_v40 }
  0x80   :  { %818 = vmatmul.mubr.f32.gmra.mxu1 %v2585_v18  ;;  %254 = vperm.xlu0 %1577, %v232_v44  }
  0x81   :  { %526 = vmatmul.mubr.f32.gmra.mxu0 %v55_v42  ;;  %823 = vmatprep.mubr.f32.mxu1 %v2590_v19 }
  0x82   :  { %531 = vmatprep.mubr.f32.mxu0 %v59_v43  ;;  %1572 = vmatpush1.msra.mxu1 %v205_v22 }
  0x83   :  { %259 = vperm.xlu1 %1578, %v233_v45   ;;  %1564 = vmatprep.subr.mxu1 %v202_v25 }
  0x84   :  { %824 = vmatmul.mubr.f32.gmra.mxu1 %v2607_v23  ;;  %269 = vperm.xlu0 %1577, %v235_v52  }
  0x85   :  { %532 = vmatmul.mubr.f32.gmra.mxu0 %v58_v48  ;;  %829 = vmatprep.mubr.f32.mxu1 %v2613_v24 }
  0x86   :  { %537 = vmatprep.mubr.f32.mxu0 %v62_v50  ;;  %1573 = vmatpush1.msra.mxu1 %v201_v26 }
  0x87   :  { %1565 = vmatprep.subr.mxu1 %v198_v31  ;;  %264 = vperm.xlu1 %1578, %v234_v51  }
  0x88   :  { %830 = vmatmul.mubr.f32.gmra.mxu1 %v2629_v28  ;;  %279 = vperm.xlu0 %1577, %v237_v58  }
  0x89   :  { %538 = vmatmul.mubr.f32.gmra.mxu0 %v61_v53  ;;  %835 = vmatprep.mubr.f32.mxu1 %v2635_v30 }
  0x8a   :  { %543 = vmatprep.mubr.f32.mxu0 %v65_v54  ;;  %1574 = vmatpush1.msra.mxu1 %v197_v32 }
  0x8b   :  { %274 = vperm.xlu1 %1578, %v236_v57  }
  0x8c   :  { %836 = vmatmul.mubr.f32.gmra.mxu1 %v49_v33  ;;  %289 = vperm.xlu0 %1577, %v239_v62  }
  0x8d   :  { %544 = vmatmul.mubr.f32.gmra.mxu0 %v64_v60  ;;  %841 = vmatprep.mubr.f32.mxu1 %v2652_v34 }
  0x8e   :  { %936 = vmatprep.mubr.f32.mxu0 %v1835_v3 }
  0x8f   :  { %284 = vperm.xlu1 %1578, %v238_v61  }
  0x90   :  { %842 = vmatmul.mubr.f32.gmra.mxu1 %v52_v36  ;;  %299 = vperm.xlu0 %1577, %v241_v0  }
  0x91   :  { %1493 = vmatmul.mubr.msk.f32.vlgmr.msra.gmra.mxu0 %vm327_vm1, %v1984_v38  ;;  %847 = vmatprep.mubr.f32.mxu1 %v56_v37  ;;  %v243_v38 = vld [vmem:[%s3301_s1 + $0x60] sm:$0xff] }
  0x92   :  { %942 = vmatprep.mubr.f32.mxu0 %v1835_v3 }
  0x93   :  { %294 = vperm.xlu1 %1578, %v240_v63  }
  0x94   :  { %848 = vmatmul.mubr.f32.gmra.mxu1 %v55_v42  ;;  %309 = vperm.xlu0 %1577, %v243_v38  }
  0x95   :  { %1494 = vmatmul.mubr.msk.f32.gmra.mxu0 %vm327_vm1, %v2015_v47  ;;  %853 = vmatprep.mubr.f32.mxu1 %v59_v43  ;;  %v245_v47 = vld [vmem:[%s3301_s1 + $0x70] sm:$0xff] }
  0x96   :  { %948 = vmatprep.mubr.f32.mxu0 %v1835_v3 }
  0x97   :  { %304 = vperm.xlu1 %1578, %v242_v2  }
  0x98   :  { %854 = vmatmul.mubr.f32.gmra.mxu1 %v58_v48  ;;  %319 = vperm.xlu0 %1577, %v245_v47  }
  0x99   :  { %1495 = vmatmul.mubr.msk.f32.gmra.mxu0 %vm327_vm1, %v2047_v56  ;;  %859 = vmatprep.mubr.f32.mxu1 %v62_v50 }
  0x9a   :  { %954 = vmatprep.mubr.f32.mxu0 %v1835_v3 }
  0x9b   :  { %314 = vperm.xlu1 %1578, %v244_v4  }
  0x9c   :  { %860 = vmatmul.mubr.f32.gmra.mxu1 %v61_v53 }
  0x9d   :  { %1496 = vmatmul.mubr.msk.f32.gmra.mxu0 %vm327_vm1, %v2079_v1  ;;  %865 = vmatprep.mubr.f32.mxu1 %v65_v54 }
  0x9e   :  { %960 = vmatprep.mubr.f32.mxu0 %v1835_v3 }
  0x9f   :  { %324 = vperm.xlu1 %1578, %v246_v5  }
  0xa0   :  { %866 = vmatmul.mubr.f32.gmra.mxu1 %v64_v60 }
  0xa1   :  { %1497 = vmatmul.mubr.msk.f32.gmra.mxu0 %vm327_vm1, %v2111_v11  ;;  %1002 = vmatprep.mubr.f32.mxu1 %v1835_v3 }
  0xa2   :  { %966 = vmatprep.mubr.f32.mxu0 %v1835_v3 }
  0xa4   :  { %1504 = vmatmul.mubr.msk.f32.vlgmr.msra.gmra.mxu1 %vm327_vm1, %v2335_v16 }
  0xa5   :  { %1498 = vmatmul.mubr.msk.f32.gmra.mxu0 %vm327_vm1, %v2143_v20  ;;  %1008 = vmatprep.mubr.f32.mxu1 %v1835_v3 }
  0xa6   :  { %972 = vmatprep.mubr.f32.mxu0 %v1835_v3 }
  0xa8   :  { %1505 = vmatmul.mubr.msk.f32.gmra.mxu1 %vm327_vm1, %v2380_v27 }
  0xa9   :  { %1499 = vmatmul.mubr.msk.f32.gmra.mxu0 %vm327_vm1, %v2175_v29  ;;  %1014 = vmatprep.mubr.f32.mxu1 %v1835_v3 }
  0xaa   :  { %978 = vmatprep.mubr.f32.mxu0 %v1835_v3 }
  0xac   :  { %1506 = vmatmul.mubr.msk.f32.gmra.mxu1 %vm327_vm1, %v2415_v35 }
  0xad   :  { %1500 = vmatmul.mubr.msk.f32.gmra.mxu0 %vm327_vm1, %v2207_v39  ;;  %1020 = vmatprep.mubr.f32.mxu1 %v1835_v3 }
  0xae   :  { %984 = vmatprep.mubr.f32.mxu0 %v1835_v3 }
  0xb0   :  { %1507 = vmatmul.mubr.msk.f32.gmra.mxu1 %vm327_vm1, %v2458_v46 }
  0xb1   :  { %1501 = vmatmul.mubr.msk.f32.gmra.mxu0 %vm327_vm1, %v2239_v49  ;;  %1026 = vmatprep.mubr.f32.mxu1 %v1835_v3 }
  0xb2   :  { %990 = vmatprep.mubr.f32.mxu0 %v1835_v3 }
  0xb4   :  { %1508 = vmatmul.mubr.msk.f32.gmra.mxu1 %vm327_vm1, %v2491_v55 }
  0xb5   :  { %1502 = vmatmul.mubr.msk.f32.gmra.mxu0 %vm327_vm1, %v2271_v59 }
  0xb6   :  { %996 = vmatprep.mubr.f32.mxu0 %v1835_v3 }
  0xb9   :  { %1503 = vmatmul.mubr.msk.f32.gmra.mxu0 %vm327_vm1, %v2303_v6 }
  0xd5   :  { %v616_v56 = vpop.f32.mrf.mxu1 }
  0xd7   :  { %v618_v1 = vpop.f32.mrf.mxu1 }
  0xda   :  { %v622_v11 = vpop.f32.mrf.mxu1 }
  0xdc   :  { %v624_v20 = vpop.f32.mrf.mxu1 }
  0xdf   :  { %v628_v29 = vpop.f32.mrf.mxu1 }
  0xe1   :  { %v630_v39 = vpop.f32.mrf.mxu1 }
  0xe4   :  { %v634_v49 = vpop.f32.mrf.mxu1 }
  0xe6   :  { %v2789_v16 = vpop.f32.mrf.mxu1 }
  0xe9   :  { %v2791_v27 = vpop.f32.mrf.mxu1 }
  0xeb   :  { %v2793_v35 = vpop.f32.mrf.mxu1 }
  0xee   :  { %v2795_v46 = vpop.f32.mrf.mxu1 }
  0xf0   :  { %v2797_v59 = vpop.f32.mrf.mxu1 }
  0xf3   :  { %v2799_v3 = vpop.f32.mrf.mxu1 }
  0xf5   :  { %v2801_v6 = vpop.f32.mrf.mxu1 }
  0xf7   :  { %v2821_v17 = vpop.permute.xlu0 %249 }
  0xf8   :  { %v2803_v55 = vpop.f32.mrf.mxu1 }
  0xfa   :  { %v2805_v7 = vpop.f32.mrf.mxu1 }
  0xfb   :  { %v2829_v26 = vpop.permute.xlu0 %254 }
  0xfd   :  { %v2807_v8 = vpop.f32.mrf.mxu1 }
  0xfe   :  { %v2834_v34 = vpop.permute.xlu1 %259 }
  0xff   :  { %v2809_v9 = vpop.f32.mrf.mxu1  ;;  %v2850_v2 = vpop.permute.xlu0 %269 }
 0x102   :  { %v2811_v10 = vpop.f32.mrf.mxu1  ;;  %v2845_v58 = vpop.permute.xlu1 %264 }
 0x104   :  { %v2813_v12 = vpop.f32.mrf.mxu1 }
 0x107   :  { %v2815_v13 = vpop.f32.mrf.mxu1 }
 0x109   :  { %v2817_v14 = vpop.f32.mrf.mxu1 }
 0x10c   :  { %v2819_v15 = vpop.f32.mrf.mxu1 }
 0x10e   :  { %v2823_v18 = vpop.f32.mrf.mxu1  ;;  %v455_v19 = vpop.f32.mrf.mxu0 }
 0x10f   :  { %v456_v21 = vadd.f32 %v455_v19, %v2821_v17 }
 0x110   :  { %v457_v22 = vpop.f32.mrf.mxu0 }
 0x111   :  { %v617_v23 = vadd.f32 %v616_v56, %v456_v21  ;;  %v458_v24 = vadd.f32 %v457_v22, %v2821_v17  ;;  %v2827_v25 = vpop.f32.mrf.mxu1  ;;  %v2859_v21 = vpop.permute.xlu1 %274 }
 0x113   :  { %v1509_v28 = vmul.f32 -1.442695, %v617_v23  ;;  %v619_v30 = vadd.f32 %v618_v1, %v458_v24  ;;  %v461_v31 = vpop.f32.mrf.mxu0  ;;  %v2831_v32 = vpop.f32.mrf.mxu1 }
 0x114   :  { %v462_v33 = vadd.f32 %v461_v31, %v2829_v26 }
 0x115   :  { %v1510_v36 = vmul.f32 -1.442695, %v619_v30  ;;  %v463_v37 = vpop.f32.mrf.mxu0  ;;  %1579 = vpow2.f32 %v1509_v28 }
 0x116   :  { %v2836_v40 = vpop.f32.mrf.mxu1  ;;  %v623_v41 = vadd.f32 %v622_v11, %v462_v33  ;;  %v464_v42 = vadd.f32 %v463_v37, %v2829_v26 }
 0x117   :  { %v467_v43 = vpop.f32.mrf.mxu0  ;;  %1581 = vpow2.f32 %v1510_v36 }
 0x118   :  { %v2839_v44 = vpop.f32.mrf.mxu1  ;;  %v1513_v45 = vmul.f32 -1.442695, %v623_v41  ;;  %v625_v48 = vadd.f32 %v624_v20, %v464_v42  ;;  %v468_v50 = vadd.f32 %v467_v43, %v2834_v34  ;;  %v2869_v43 = vpop.permute.xlu0 %279 }
 0x119   :  { %v469_v51 = vpop.f32.mrf.mxu0 }
 0x11a   :  { %1583 = vpow2.f32 %v1513_v45  ;;  %v1514_v52 = vmul.f32 -1.442695, %v625_v48  ;;  %v629_v53 = vadd.f32 %v628_v29, %v468_v50  ;;  %v470_v54 = vadd.f32 %v469_v51, %v2834_v34  ;;  %v2843_v57 = vpop.f32.mrf.mxu1 }
 0x11c   :  { %1585 = vpow2.f32 %v1514_v52  ;;  %v1517_v60 = vmul.f32 -1.442695, %v629_v53  ;;  %v631_v61 = vadd.f32 %v630_v39, %v470_v54  ;;  %v473_v62 = vpop.f32.mrf.mxu0  ;;  %v2847_v63 = vpop.f32.mrf.mxu1 }
 0x11d   :  { %v474_v0 = vadd.f32 %v473_v62, %v2845_v58 }
 0x11e   :  { %1587 = vpow2.f32 %v1517_v60  ;;  %v1518_v38 = vmul.f32 -1.442695, %v631_v61  ;;  %v475_v4 = vpop.f32.mrf.mxu0 }
 0x11f   :  { %v2852_v47 = vpop.f32.mrf.mxu1  ;;  %v635_v5 = vadd.f32 %v634_v49, %v474_v0  ;;  %v476_v56 = vadd.f32 %v475_v4, %v2845_v58 }
 0x120   :  { %1589 = vpow2.f32 %v1518_v38 }
 0x121   :  { %v479_v1 = vpop.f32.mrf.mxu0  ;;  %v2855_v11 = vpop.f32.mrf.mxu1  ;;  %v1521_v20 = vmul.f32 -1.442695, %v635_v5  ;;  %v637_v29 = vadd.f32 %v2789_v16, %v476_v56 }
 0x122   :  { %v480_v39 = vadd.f32 %v479_v1, %v2850_v2  ;;  %v1580_v22 = vpop.eup %1579 }
 0x123   :  { %v481_v19 = vpop.f32.mrf.mxu0  ;;  %v1522_v23 = vmul.f32 -1.442695, %v637_v29  ;;  %1591 = vpow2.f32 %v1521_v20  ;;  %v1177_v37 = vadd.f32 1.0, %v1580_v22 }
 0x124   :  { %v641_v24 = vadd.f32 %v2791_v27, %v480_v39  ;;  %v2862_v28 = vpop.f32.mrf.mxu1  ;;  %v482_v49 = vadd.f32 %v481_v19, %v2850_v2  ;;  %v1582_v31 = vpop.eup %1581 }
 0x125   :  { %v485_v30 = vpop.f32.mrf.mxu0  ;;  %1593 = vpow2.f32 %v1522_v23  ;;  %v1178_v51 = vadd.f32 1.0, %v1582_v31 }
 0x126   :  { %v1525_v33 = vmul.f32 -1.442695, %v641_v24  ;;  %v486_v16 = vadd.f32 %v485_v30, %v2859_v21  ;;  %v2866_v36 = vpop.f32.mrf.mxu1  ;;  %v643_v41 = vadd.f32 %v2793_v35, %v482_v49 }
 0x127   :  { %v487_v42 = vpop.f32.mrf.mxu0  ;;  %v1584_v45 = vpop.eup %1583 }
 0x128   :  { %v647_v27 = vadd.f32 %v2795_v46, %v486_v16  ;;  %v488_v48 = vadd.f32 %v487_v42, %v2859_v21  ;;  %v2873_v50 = vpop.f32.mrf.mxu1  ;;  %v1526_v52 = vmul.f32 -1.442695, %v643_v41  ;;  %1595 = vpow2.f32 %v1525_v33  ;;  %v2879_v46 = vpop.permute.xlu1 %284 }
 0x129   :  { %v491_v53 = vpop.f32.mrf.mxu0  ;;  %v1586_v54 = vpop.eup %1585  ;;  %1597 = vrcp.f32 %v1177_v37  ;;  %v1181_v0 = vadd.f32 1.0, %v1584_v45 }
 0x12a   :  { %v1529_v60 = vmul.f32 -1.442695, %v647_v27  ;;  %v649_v61 = vadd.f32 %v2797_v59, %v488_v48  ;;  %v492_v35 = vadd.f32 %v491_v53, %v2869_v43  ;;  %v2877_v62 = vpop.f32.mrf.mxu1  ;;  %1599 = vpow2.f32 %v1526_v52  ;;  %v2893_v37 = vpop.permute.xlu0 %289 }
 0x12b   :  { %v493_v38 = vpop.f32.mrf.mxu0  ;;  %v1588_v4 = vpop.eup %1587  ;;  %1601 = vrcp.f32 %v1178_v51  ;;  %v1182_v59 = vadd.f32 1.0, %v1586_v54 }
 0x12c   :  { %v1530_v5 = vmul.f32 -1.442695, %v649_v61  ;;  %v653_v56 = vadd.f32 %v2799_v3, %v492_v35  ;;  %v494_v1 = vadd.f32 %v493_v38, %v2869_v43  ;;  %v2883_v20 = vpop.f32.mrf.mxu1  ;;  %1603 = vpow2.f32 %v1529_v60  ;;  %v2899_v52 = vpop.permute.xlu1 %294 }
 0x12d   :  { %v497_v29 = vpop.f32.mrf.mxu0  ;;  %1605 = vrcp.f32 %v1181_v0  ;;  %v1185_v24 = vadd.f32 1.0, %v1588_v4  ;;  %v1590_v30 = vpop.eup %1589  ;;  %3313 = vst [vmem:[#allocation2_spill] sm:$0xff] %v2899_v52 }
 0x12e   :  { %v1533_v39 = vmul.f32 -1.442695, %v653_v56  ;;  %v655_v19 = vadd.f32 %v2801_v6, %v494_v1  ;;  %v498_v22 = vadd.f32 %v497_v29, %v2879_v46  ;;  %v2887_v23 = vpop.f32.mrf.mxu1  ;;  %1607 = vpow2.f32 %v1530_v5 }
 0x12f   :  { %v499_v49 = vpop.f32.mrf.mxu0  ;;  %1609 = vrcp.f32 %v1182_v59  ;;  %v1186_v48 = vadd.f32 1.0, %v1590_v30 }
 0x130   :  { %v1534_v3 = vmul.f32 -1.442695, %v655_v19  ;;  %v659_v31 = vadd.f32 %v2803_v55, %v498_v22  ;;  %v500_v33 = vadd.f32 %v499_v49, %v2879_v46  ;;  %v2891_v16 = vpop.f32.mrf.mxu1  ;;  %v1592_v41 = vpop.eup %1591  ;;  %1611 = vpow2.f32 %v1533_v39 }
 0x131   :  { %v503_v6 = vpop.f32.mrf.mxu0  ;;  %v1189_v35 = vadd.f32 1.0, %v1592_v41  ;;  %v2915_v49 = vpop.permute.xlu0 %299 }
 0x132   :  { %v1537_v42 = vmul.f32 -1.442695, %v659_v31  ;;  %v661_v45 = vadd.f32 %v2805_v7, %v500_v33  ;;  %v2896_v27 = vpop.f32.mrf.mxu1  ;;  %1613 = vpow2.f32 %v1534_v3  ;;  %v504_v51 = vadd.f32 %v503_v6, %v2893_v37  ;;  %v1594_v61 = vpop.eup %1593  ;;  %3314 = vst [vmem:[#allocation3_spill] sm:$0xff] %v2915_v49 }
 0x133   :  { %v505_v55 = vpop.f32.mrf.mxu0  ;;  %1615 = vrcp.f32 %v1185_v24  ;;  %v1190_v39 = vadd.f32 1.0, %v1594_v61 }
 0x134   :  { %v1538_v53 = vmul.f32 -1.442695, %v661_v45  ;;  %v506_v54 = vadd.f32 %v505_v55, %v2893_v37  ;;  %v2902_v60 = vpop.f32.mrf.mxu1  ;;  %1617 = vpow2.f32 %v1537_v42  ;;  %v665_v7 = vadd.f32 %v2807_v8, %v504_v51  ;;  %v2923_v51 = vpop.permute.xlu1 %304 }
 0x135   :  { %v509_v0 = vpop.f32.mrf.mxu0  ;;  %v1596_v56 = vpop.eup %1595 }
 0x136   :  { %1619 = vpow2.f32 %v1538_v53  ;;  %v667_v38 = vadd.f32 %v2809_v9, %v506_v54  ;;  %v510_v4 = vadd.f32 %v509_v0, %v2899_v52  ;;  %v2907_v5 = vpop.f32.mrf.mxu1  ;;  %v1541_v1 = vmul.f32 -1.442695, %v665_v7  ;;  %v2909_v29 = vpop.eup %1597 }
 0x137   :  { %1621 = vrcp.f32 %v1186_v48  ;;  %v511_v59 = vpop.f32.mrf.mxu0  ;;  %v1600_v9 = vpop.eup %1599  ;;  %v1193_v31 = vadd.f32 1.0, %v1596_v56 }
 0x138   :  { %v1542_v19 = vmul.f32 -1.442695, %v667_v38  ;;  %v671_v22 = vadd.f32 %v2811_v10, %v510_v4  ;;  %v512_v8 = vadd.f32 %v511_v59, %v2899_v52  ;;  %v2913_v24 = vpop.f32.mrf.mxu1  ;;  %1623 = vrcp.f32 %v1189_v35  ;;  %v2917_v3 = vpop.eup %1601 }
 0x139   :  { %v515_v30 = vpop.f32.mrf.mxu0  ;;  %1625 = vpow2.f32 %v1541_v1  ;;  %v1604_v42 = vpop.eup %1603  ;;  %v1194_v10 = vadd.f32 1.0, %v1600_v9 }
 0x13a   :  { %v1545_v33 = vmul.f32 -1.442695, %v671_v22  ;;  %v673_v6 = vadd.f32 %v2813_v12, %v512_v8  ;;  %v2920_v41 = vpop.f32.mrf.mxu1  ;;  %1627 = vpow2.f32 %v1542_v19  ;;  %v516_v45 = vadd.f32 %v515_v30, %v2915_v49  ;;  %v2925_v55 = vpop.eup %1605 }
 0x13b   :  { %v517_v48 = vpop.f32.mrf.mxu0  ;;  %1629 = vrcp.f32 %v1190_v39  ;;  %v1608_v35 = vpop.eup %1607  ;;  %v1197_v12 = vadd.f32 1.0, %v1604_v42 }
 0x13c   :  { %v1546_v53 = vmul.f32 -1.442695, %v673_v6  ;;  %v518_v54 = vadd.f32 %v517_v48, %v2915_v49  ;;  %v2928_v61 = vpop.f32.mrf.mxu1  ;;  %1631 = vpow2.f32 %v1545_v33  ;;  %v677_v7 = vadd.f32 %v2815_v13, %v516_v45  ;;  %v2931_v38 = vpop.eup %1609 }
 0x13d   :  { %v521_v0 = vpop.f32.mrf.mxu0  ;;  %1633 = vrcp.f32 %v1193_v31  ;;  %v1198_v4 = vadd.f32 1.0, %v1608_v35  ;;  %v1612_v39 = vpop.eup %1611 }
 0x13e   :  { %v679_v56 = vadd.f32 %v2817_v14, %v518_v54  ;;  %v522_v1 = vadd.f32 %v521_v0, %v2923_v51  ;;  %v2935_v59 = vpop.f32.mrf.mxu1  ;;  %1635 = vrcp.f32 %v1194_v10  ;;  %v1549_v19 = vmul.f32 -1.442695, %v677_v7  ;;  %v2937_v8 = vpop.permute.xlu0 %309 }
 0x13f   :  { %v523_v22 = vpop.f32.mrf.mxu0  ;;  %v1614_v9 = vpop.eup %1613  ;;  %1637 = vpow2.f32 %v1546_v53  ;;  %v1201_v31 = vadd.f32 1.0, %v1612_v39 }
 0x140   :  { %v1550_v13 = vmul.f32 -1.442695, %v679_v56  ;;  %v2939_v30 = vpop.f32.mrf.mxu1  ;;  %v2941_v33 = vpop.eup %1615  ;;  %1639 = vrcp.f32 %v1197_v12  ;;  %v524_v14 = vadd.f32 %v523_v22, %v2923_v51  ;;  %v1202_v45 = vadd.f32 1.0, %v1614_v9 }
 0x141   :  { %v527_v6 = vpop.f32.mrf.mxu0  ;;  %v1618_v42 = vpop.eup %1617  ;;  %1641 = vrcp.f32 %v1198_v4  ;;  %v683_v10 = vadd.f32 %v2819_v15, %v522_v1 }
 0x142   :  { %v528_v48 = vadd.f32 %v527_v6, %v2937_v8  ;;  %v2946_v54 = vpop.f32.mrf.mxu1  ;;  %v1205_v35 = vadd.f32 1.0, %v1618_v42  ;;  %1643 = vpow2.f32 %v1549_v19  ;;  %v685_v7 = vadd.f32 %v2823_v18, %v524_v14  ;;  %v2949_v12 = vpop.permute.xlu1 %314 }
 0x143   :  { %v1620_v53 = vpop.eup %1619  ;;  %v529_v0 = vpop.f32.mrf.mxu0  ;;  %1645 = vpow2.f32 %v1550_v13  ;;  %v1553_v19 = vmul.f32 -1.442695, %v683_v10 }
 0x144   :  { %v2951_v56 = vpop.eup %1621  ;;  %v1206_v39 = vadd.f32 1.0, %v1620_v53  ;;  %v530_v4 = vadd.f32 %v529_v0, %v2937_v8  ;;  %v2954_v22 = vpop.f32.mrf.mxu1  ;;  %1647 = vrcp.f32 %v1201_v31  ;;  %v689_v15 = vadd.f32 %v2827_v25, %v528_v48 }
 0x145   :  { %3315 = vst [vmem:[#allocation4_spill] sm:$0xff] %v2954_v22  ;;  %v533_v1 = vpop.f32.mrf.mxu0  ;;  %v2957_v9 = vpop.eup %1623  ;;  %1649 = vrcp.f32 %v1202_v45  ;;  %v1554_v42 = vmul.f32 -1.442695, %v685_v7 }
 0x146   :  { %v534_v18 = vadd.f32 %v533_v1, %v2949_v12  ;;  %v2960_v14 = vpop.f32.mrf.mxu1  ;;  %v1626_v6 = vpop.eup %1625  ;;  %1651 = vrcp.f32 %v1205_v35  ;;  %v691_v31 = vadd.f32 %v2831_v32, %v530_v4 }
 0x147   :  { %3316 = vst [vmem:[#allocation5_spill] sm:$0xff] %v2960_v14  ;;  %v535_v13 = vpop.f32.mrf.mxu0  ;;  %v2962_v53 = vpop.permute.xlu0 %319  ;;  %1653 = vrcp.f32 %v1206_v39  ;;  %v1209_v10 = vadd.f32 1.0, %v1626_v6 }
 0x148   :  { %3317 = vst [vmem:[#allocation6_spill] sm:$0xff] %v2962_v53  ;;  %v1628_v0 = vpop.eup %1627  ;;  %v536_v25 = vadd.f32 %v535_v13, %v2949_v12  ;;  %v2966_v48 = vpop.f32.mrf.mxu1  ;;  %1655 = vtanh.f32 %v689_v15  ;;  %v695_v35 = vadd.f32 %v2836_v40, %v534_v18 }
 0x149   :  { %3318 = vst [vmem:[#allocation7_spill] sm:$0xff] %v2966_v48  ;;  %v2968_v45 = vpop.eup %1629  ;;  %v539_v1 = vpop.f32.mrf.mxu0  ;;  %1657 = vpow2.f32 %v1553_v19  ;;  %v1210_v32 = vadd.f32 1.0, %v1628_v0 }
 0x14a   :  { %v1632_v49 = vpop.eup %1631  ;;  %v540_v7 = vadd.f32 %v539_v1, %v2962_v53  ;;  %v2972_v52 = vpop.f32.mrf.mxu1  ;;  %1659 = vpow2.f32 %v1554_v42  ;;  %v697_v15 = vadd.f32 %v2839_v44, %v536_v25 }
 0x14b   :  { %3319 = vst [vmem:[#allocation8_spill] sm:$0xff] %v2972_v52  ;;  %v2974_v39 = vpop.eup %1633  ;;  %v541_v4 = vpop.f32.mrf.mxu0  ;;  %1661 = vtanh.f32 %v691_v31  ;;  %v1213_v18 = vadd.f32 1.0, %v1632_v49  ;;  %v778_v49 = vadd.f32 %v2862_v28, %v2821_v17 }
 0x14c   :  { %v2976_v13 = vpop.permute.xlu1 %324  ;;  %v2978_v48 = vpop.eup %1635  ;;  %v542_v19 = vadd.f32 %v541_v4, %v2962_v53  ;;  %1663 = vrcp.f32 %v1209_v10  ;;  %v701_v42 = vadd.f32 %v2843_v57, %v540_v7 }
 0x14d   :  { %3320 = vst [vmem:[#allocation9_spill] sm:$0xff] %v2976_v13  ;;  %v2982_v6 = vpop.f32.mrf.mxu1  ;;  %v1638_v40 = vpop.eup %1637  ;;  %1665 = vtanh.f32 %v695_v35 }
 0x14e   :  { %3321 = vst [vmem:[#allocation10_spill] sm:$0xff] %v2982_v6  ;;  %v545_v1 = vpop.f32.mrf.mxu0  ;;  %v2984_v52 = vpop.eup %1639  ;;  %1667 = vrcp.f32 %v1210_v32  ;;  %v703_v44 = vadd.f32 %v2847_v63, %v542_v19  ;;  %v1214_v10 = vadd.f32 1.0, %v1638_v40  ;;  %v780_v63 = vadd.f32 %v2866_v36, %v2821_v17  ;;  %v1337_v17 = vld [vmem:[%s3302_s3] sm:$0xff] }
 0x14f   :  { %v546_v0 = vadd.f32 %v545_v1, %v2976_v13  ;;  %v2988_v14 = vpop.f32.mrf.mxu1  ;;  %v2990_v31 = vpop.eup %1641  ;;  %1669 = vtanh.f32 %v697_v15 }
 0x150   :  { %3322 = vst [vmem:[#allocation11_spill] sm:$0xff] %v2988_v14  ;;  %v547_v25 = vpop.f32.mrf.mxu0  ;;  %v1644_v4 = vpop.eup %1643  ;;  %1671 = vrcp.f32 %v1213_v18 }
 0x151   :  { %v548_v35 = vadd.f32 %v547_v25, %v2976_v13  ;;  %v2996_v6 = vpop.f32.mrf.mxu1  ;;  %v1646_v57 = vpop.eup %1645  ;;  %v707_v7 = vadd.f32 %v2852_v47, %v546_v0  ;;  %1673 = vtanh.f32 %v701_v42  ;;  %v1217_v40 = vadd.f32 1.0, %v1644_v4 }
 0x152   :  { %v938_v1 = vpop.f32.mrf.mxu0  ;;  %v2999_v14 = vpop.eup %1647  ;;  %1675 = vtanh.f32 %v703_v44  ;;  %v784_v47 = vadd.f32 %v2873_v50, %v2829_v26  ;;  %v1218_v0 = vadd.f32 1.0, %v1646_v57  ;;  %v1338_v50 = vld [vmem:[%s3302_s3 + $0x8] sm:$0xff] }
 0x153   :  { %v709_v32 = vadd.f32 %v2855_v11, %v548_v35  ;;  %v3004_v28 = vpop.f32.mrf.mxu1  ;;  %v939_v15 = vadd.f32 %v938_v1, %v778_v49  ;;  %v3006_v19 = vpop.eup %1649  ;;  %1677 = vrcp.f32 %v1214_v10  ;;  %v786_v35 = vadd.f32 %v2877_v62, %v2829_v26  ;;  %v1341_v62 = vld [vmem:[%s3302_s3 + $0x20] sm:$0xff] }
 0x154   :  { %v940_v25 = vpop.f32.mrf.mxu0  ;;  %v3008_v18 = vpop.eup %1651  ;;  %1679 = vtanh.f32 %v707_v7  ;;  %v790_v26 = vadd.f32 %v2883_v20, %v2834_v34 }
 0x155   :  { %v3015_v11 = vpop.f32.mrf.mxu1  ;;  %v941_v36 = vadd.f32 %v940_v25, %v780_v63  ;;  %v3017_v42 = vpop.eup %1653  ;;  %v1511_v4 = vmul.f32 -1.442695, %v939_v15  ;;  %1681 = vtanh.f32 %v709_v32  ;;  %v1353_v63 = vmul.f32 %v2974_v39, %v1337_v17 }
 0x156   :  { %v944_v44 = vpop.f32.mrf.mxu0  ;;  %v1656_v49 = vpop.eup %1655  ;;  %1683 = vrcp.f32 %v1217_v40  ;;  %v1354_v39 = vmul.f32 %v2978_v48, %v1338_v50  ;;  %v1357_v48 = vmul.f32 %v2984_v52, %v1341_v62  ;;  %v1345_v52 = vld [vmem:[%s3302_s3 + $0x40] sm:$0xff] }
 0x157   :  { %v1512_v10 = vmul.f32 -1.442695, %v941_v36  ;;  %v3024_v57 = vpop.f32.mrf.mxu1  ;;  %v945_v1 = vadd.f32 %v944_v44, %v784_v47  ;;  %v1658_v13 = vpop.eup %1657  ;;  %v1369_v7 = vmul.f32 %v1656_v49, %v2909_v29  ;;  %1685 = vrcp.f32 %v1218_v0 }
 0x158   :  { %v946_v15 = vpop.f32.mrf.mxu0  ;;  %v3028_v25 = vpop.eup %1659  ;;  %1687 = vpow2.f32 %v1511_v4 }
 0x159   :  { %v1515_v32 = vmul.f32 -1.442695, %v945_v1  ;;  %v3035_v36 = vpop.f32.mrf.mxu1  ;;  %v947_v47 = vadd.f32 %v946_v15, %v786_v35  ;;  %v1662_v40 = vpop.eup %1661  ;;  %v1385_v44 = vadd.f32 %v1369_v7, %v1353_v63  ;;  %1689 = vpow2.f32 %v1512_v10 }
 0x15a   :  { %v950_v29 = vpop.f32.mrf.mxu0  ;;  %v3038_v17 = vpop.eup %1663  ;;  %v1370_v49 = vmul.f32 %v1662_v40, %v2917_v3  ;;  %v792_v1 = vadd.f32 %v2887_v23, %v2834_v34  ;;  %v1342_v3 = vld [vmem:[%s3302_s3 + $0x28] sm:$0xff]  ;;  %v796_v7 = vadd.f32 %v2891_v16, %v2845_v58  ;;  %v1221_v15 = vadd.f32 1.0, %v1658_v13 }
 0x15b   :  { %v1516_v20 = vmul.f32 -1.442695, %v947_v47  ;;  %v3041_v0 = vpop.f32.mrf.mxu1  ;;  %v951_v53 = vadd.f32 %v950_v29, %v790_v26  ;;  %v1666_v22 = vpop.eup %1665  ;;  %1691 = vtanh.f32 %v1385_v44  ;;  %1449 = vst [vmem:[%s3303_s5] sm:$0xff] %v1385_v44  ;;  %v798_v40 = vadd.f32 %v2896_v27, %v2845_v58 }
 0x15c   :  { %v952_v4 = vpop.f32.mrf.mxu0  ;;  %v3052_v35 = vpop.eup %1667  ;;  %v1386_v50 = vadd.f32 %v1370_v49, %v1354_v39  ;;  %v1373_v10 = vmul.f32 %v1666_v22, %v2925_v55  ;;  %1693 = vpow2.f32 %v1515_v32  ;;  %v1358_v22 = vmul.f32 %v2990_v31, %v1342_v3  ;;  %v1349_v39 = vld [vmem:[%s3302_s3 + $0x60] sm:$0xff] }
 0x15d   :  { %v1519_v63 = vmul.f32 -1.442695, %v951_v53  ;;  %v3055_v34 = vpop.f32.mrf.mxu1  ;;  %v1670_v23 = vpop.eup %1669  ;;  %1695 = vpow2.f32 %v1516_v20  ;;  %v953_v26 = vadd.f32 %v952_v4, %v792_v1  ;;  %v1346_v53 = vld [vmem:[%s3302_s3 + $0x48] sm:$0xff]  ;;  %v802_v44 = vadd.f32 %v2902_v60, %v2850_v2 }
 0x15e   :  { %v956_v62 = vpop.f32.mrf.mxu0  ;;  %v3062_v47 = vpop.eup %1671  ;;  %1697 = vtanh.f32 %v1386_v50  ;;  %1450 = vst [vmem:[%s3303_s5 + $0x8] sm:$0xff] %v1386_v50  ;;  %v1389_v55 = vadd.f32 %v1373_v10, %v1357_v48  ;;  %v1374_v16 = vmul.f32 %v1670_v23, %v2931_v38  ;;  %v1361_v20 = vmul.f32 %v2999_v14, %v1345_v52  ;;  %v1350_v4 = vld [vmem:[%s3302_s3 + $0x68] sm:$0xff] }
 0x15f   :  { %v3072_v13 = vpop.f32.mrf.mxu1  ;;  %v1674_v32 = vpop.eup %1673  ;;  %1699 = vpow2.f32 %v1519_v63  ;;  %v1520_v31 = vmul.f32 -1.442695, %v953_v26  ;;  %v804_v1 = vadd.f32 %v2907_v5, %v2850_v2  ;;  %v1362_v48 = vmul.f32 %v3006_v19, %v1346_v53 }
 0x160   :  { %v958_v38 = vpop.f32.mrf.mxu0  ;;  %v1676_v29 = vpop.eup %1675  ;;  %1701 = vtanh.f32 %v1389_v55  ;;  %1453 = vst [vmem:[%s3303_s5 + $0x20] sm:$0xff] %v1389_v55  ;;  %v1390_v49 = vadd.f32 %v1374_v16, %v1358_v22  ;;  %v1377_v58 = vmul.f32 %v1674_v32, %v2941_v33  ;;  %v1222_v33 = vadd.f32 1.0, %v3028_v25 }
 0x161   :  { %v3086_v27 = vpop.f32.mrf.mxu1  ;;  %v3088_v60 = vpop.eup %1677  ;;  %1703 = vrcp.f32 %v1221_v15  ;;  %v1378_v3 = vmul.f32 %v1676_v29, %v2951_v56  ;;  %v1365_v2 = vmul.f32 %v3008_v18, %v1349_v39  ;;  %v1366_v25 = vmul.f32 %v3017_v42, %v1350_v4 }
 0x162   :  { %v962_v50 = vpop.f32.mrf.mxu0  ;;  %v1680_v14 = vpop.eup %1679  ;;  %1705 = vtanh.f32 %v1390_v49  ;;  %1454 = vst [vmem:[%s3303_s5 + $0x28] sm:$0xff] %v1390_v49  ;;  %v1393_v10 = vadd.f32 %v1377_v58, %v1361_v20  ;;  %v957_v26 = vadd.f32 %v956_v62, %v796_v7  ;;  %v959_v16 = vadd.f32 %v958_v38, %v798_v40 }
 0x163   :  { %v3102_v5 = vpop.f32.mrf.mxu1  ;;  %v1682_v19 = vpop.eup %1681  ;;  %v1394_v56 = vadd.f32 %v1378_v3, %v1362_v48  ;;  %v1381_v63 = vmul.f32 %v1680_v14, %v2957_v9  ;;  %1707 = vpow2.f32 %v1520_v31  ;;  %v963_v23 = vadd.f32 %v962_v50, %v802_v44 }
 0x164   :  { %v964_v15 = vpop.f32.mrf.mxu0  ;;  %v3105_v52 = vpop.eup %1683  ;;  %1709 = vtanh.f32 %v1393_v10  ;;  %1457 = vst [vmem:[%s3303_s5 + $0x40] sm:$0xff] %v1393_v10  ;;  %v1382_v18 = vmul.f32 %v1682_v19, %v2968_v45  ;;  %v808_v29 = vadd.f32 %v2913_v24, %v2859_v21  ;;  %v1523_v40 = vmul.f32 -1.442695, %v957_v26 }
 0x165   :  { %v1004_v55 = vpop.f32.mrf.mxu1  ;;  %v3112_v22 = vpop.eup %1685  ;;  %1711 = vtanh.f32 %v1394_v56  ;;  %1458 = vst [vmem:[%s3303_s5 + $0x48] sm:$0xff] %v1394_v56  ;;  %v1397_v9 = vadd.f32 %v1381_v63, %v1365_v2  ;;  %v965_v39 = vadd.f32 %v964_v15, %v804_v1  ;;  %v1527_v45 = vmul.f32 -1.442695, %v963_v23 }
 0x166   :  { %v968_v53 = vpop.f32.mrf.mxu0  ;;  %v1688_v32 = vpop.eup %1687  ;;  %1713 = vrcp.f32 %v1222_v33  ;;  %v1398_v44 = vadd.f32 %v1382_v18, %v1366_v25  ;;  %v1524_v20 = vmul.f32 -1.442695, %v959_v16  ;;  %v810_v50 = vadd.f32 %v2920_v41, %v2859_v21 }
 0x167   :  { %v1690_v31 = vpop.eup %1689  ;;  %1715 = vtanh.f32 %v1397_v9  ;;  %1461 = vst [vmem:[%s3303_s5 + $0x60] sm:$0xff] %v1397_v9  ;;  %v3120_v42 = vpop.f32.mrf.mxu1  ;;  %v1528_v48 = vmul.f32 -1.442695, %v965_v39  ;;  %v969_v3 = vadd.f32 %v968_v53, %v808_v29  ;;  %v1179_v24 = vadd.f32 1.0, %v1688_v32 }
 0x168   :  { %v970_v7 = vpop.f32.mrf.mxu0  ;;  %v1692_v62 = vpop.eup %1691  ;;  %1717 = vtanh.f32 %v1398_v44  ;;  %1462 = vst [vmem:[%s3303_s5 + $0x68] sm:$0xff] %v1398_v44  ;;  %v844_v2 = vadd.f32 %v2996_v6, %v2923_v51  ;;  %v1180_v19 = vadd.f32 1.0, %v1690_v31  ;;  %v814_v21 = vadd.f32 %v2928_v61, %v2869_v43 }
 0x169   :  { %v1694_v38 = vpop.eup %1693  ;;  %v1417_v49 = vmul.f32 %v1692_v62, %v3038_v17  ;;  %1719 = vpow2.f32 %v1527_v45  ;;  %v1010_v14 = vpop.f32.mrf.mxu1  ;;  %v971_v63 = vadd.f32 %v970_v7, %v810_v50  ;;  %v1531_v25 = vmul.f32 -1.442695, %v969_v3 }
 0x16a   :  { %v974_v58 = vpop.f32.mrf.mxu0  ;;  %v1696_v1 = vpop.eup %1695  ;;  %1721 = vpow2.f32 %v1523_v40  ;;  %v1183_v41 = vadd.f32 1.0, %v1694_v38  ;;  %v816_v26 = vadd.f32 %v2935_v59, %v2869_v43  ;;  %v820_v44 = vadd.f32 %v2939_v30, %v2879_v46 }
 0x16b   :  { %v1698_v4 = vpop.eup %1697  ;;  %1433 = vst [vmem:[%s3304_s4] sm:$0xff] %v1417_v49  ;;  %1723 = vpow2.f32 %v1524_v20  ;;  %v1184_v61 = vadd.f32 1.0, %v1696_v1  ;;  %v1012_v9 = vpop.f32.mrf.mxu1  ;;  %v975_v32 = vadd.f32 %v974_v58, %v814_v21  ;;  %v1532_v39 = vmul.f32 -1.442695, %v971_v63  ;;  %v3323_v21 = vld [vmem:[#allocation4_spill] sm:$0xff] }
 0x16c   :  { %v976_v33 = vpop.f32.mrf.mxu0  ;;  %v1700_v10 = vpop.eup %1699  ;;  %v1418_v17 = vmul.f32 %v1698_v4, %v3052_v35  ;;  %1725 = vpow2.f32 %v1528_v48  ;;  %v1005_v35 = vadd.f32 %v1004_v55, %v844_v2  ;;  %v850_v29 = vadd.f32 %v3015_v11, %v2937_v8 }
 0x16d   :  { %v1702_v56 = vpop.eup %1701  ;;  %1727 = vrcp.f32 %v1179_v24  ;;  %v977_v45 = vadd.f32 %v976_v33, %v816_v26  ;;  %v1016_v40 = vpop.f32.mrf.mxu1  ;;  %v1535_v49 = vmul.f32 -1.442695, %v975_v32  ;;  %v852_v48 = vadd.f32 %v3024_v57, %v2937_v8 }
 0x16e   :  { %v1704_v23 = vpop.eup %1703  ;;  %1434 = vst [vmem:[%s3304_s4 + $0x8] sm:$0xff] %v1418_v17  ;;  %v1421_v15 = vmul.f32 %v1702_v56, %v3062_v47  ;;  %v980_v6 = vpop.f32.mrf.mxu0  ;;  %1729 = vrcp.f32 %v1180_v19  ;;  %v1187_v47 = vadd.f32 1.0, %v1700_v10  ;;  %v1555_v31 = vmul.f32 -1.442695, %v1005_v35 }
 0x16f   :  { %v1706_v18 = vpop.eup %1705  ;;  %1731 = vrcp.f32 %v1183_v41  ;;  %v1011_v11 = vadd.f32 %v1010_v14, %v850_v29  ;;  %v981_v58 = vadd.f32 %v980_v6, %v820_v44  ;;  %v1536_v3 = vmul.f32 -1.442695, %v977_v45  ;;  %v1018_v50 = vpop.f32.mrf.mxu1  ;;  %v3324_v6 = vld [vmem:[#allocation6_spill] sm:$0xff] }
 0x170   :  { %v1708_v16 = vpop.eup %1707  ;;  %1437 = vst [vmem:[%s3304_s4 + $0x20] sm:$0xff] %v1421_v15  ;;  %v1422_v53 = vmul.f32 %v1706_v18, %v3088_v60  ;;  %1733 = vpow2.f32 %v1531_v25  ;;  %v982_v60 = vpop.f32.mrf.mxu0  ;;  %v1013_v8 = vadd.f32 %v1012_v9, %v852_v48  ;;  %v856_v10 = vadd.f32 %v3035_v36, %v2949_v12 }
 0x171   :  { %v1710_v55 = vpop.eup %1709  ;;  %1735 = vrcp.f32 %v1184_v61  ;;  %v1188_v30 = vadd.f32 1.0, %v1708_v16  ;;  %v1022_v19 = vpop.f32.mrf.mxu1  ;;  %v826_v41 = vadd.f32 %v3323_v21, %v2893_v37  ;;  %v858_v35 = vadd.f32 %v3041_v0, %v2949_v12  ;;  %v3325_v16 = vld [vmem:[#allocation5_spill] sm:$0xff] }
 0x172   :  { %v1712_v43 = vpop.eup %1711  ;;  %1438 = vst [vmem:[%s3304_s4 + $0x28] sm:$0xff] %v1422_v53  ;;  %v1425_v59 = vmul.f32 %v1710_v55, %v3105_v52  ;;  %v846_v52 = vadd.f32 %v3004_v28, %v2923_v51  ;;  %1737 = vrcp.f32 %v1187_v47  ;;  %v986_v4 = vpop.f32.mrf.mxu0  ;;  %v822_v51 = vadd.f32 %v2946_v54, %v2879_v46 }
 0x173   :  { %v1714_v7 = vpop.eup %1713  ;;  %v1426_v62 = vmul.f32 %v1712_v43, %v3112_v22  ;;  %1739 = vpow2.f32 %v1532_v39  ;;  %v1539_v46 = vmul.f32 -1.442695, %v981_v58  ;;  %v862_v18 = vadd.f32 %v3055_v34, %v3324_v6  ;;  %v1024_v32 = vpop.f32.mrf.mxu1 }
 0x174   :  { %v1716_v38 = vpop.eup %1715  ;;  %1441 = vst [vmem:[%s3304_s4 + $0x40] sm:$0xff] %v1425_v59  ;;  %1741 = vpow2.f32 %v1555_v31  ;;  %v1007_v28 = vadd.f32 %v3120_v42, %v846_v52  ;;  %v983_v54 = vadd.f32 %v982_v60, %v822_v51  ;;  %v988_v42 = vpop.f32.mrf.mxu0  ;;  %v987_v26 = vadd.f32 %v986_v4, %v826_v41  ;;  %v3326_v59 = vld [vmem:[#allocation2_spill] sm:$0xff]  ;;  %v3327_v31 = vld [vmem:[#allocation7_spill] sm:$0xff]  ;;  %v3328_v52 = vld [vmem:[#allocation9_spill] sm:$0xff] }
 0x175   :  { %v1718_v20 = vpop.eup %1717  ;;  %1442 = vst [vmem:[%s3304_s4 + $0x48] sm:$0xff] %v1426_v62  ;;  %v1429_v22 = vmul.f32 %v1716_v38, %v1704_v23  ;;  %1743 = vrcp.f32 %v1188_v30  ;;  %v1017_v23 = vadd.f32 %v1016_v40, %v856_v10  ;;  %v828_v53 = vadd.f32 %v3325_v16, %v2893_v37  ;;  %v1028_v30 = vpop.f32.mrf.mxu1  ;;  %v3330_v51 = vld [vmem:[#allocation3_spill] sm:$0xff] }
 0x176   :  { %v1430_v1 = vmul.f32 %v1718_v20, %v1714_v7  ;;  %v1720_v24 = vpop.eup %1719  ;;  %1745 = vpow2.f32 %v1535_v49  ;;  %v1556_v2 = vmul.f32 -1.442695, %v1007_v28  ;;  %v1540_v36 = vmul.f32 -1.442695, %v983_v54  ;;  %v992_v61 = vpop.f32.mrf.mxu0  ;;  %v3331_v28 = vld [vmem:[#allocation10_spill] sm:$0xff]  ;;  %v3332_v41 = vld [vmem:[#allocation11_spill] sm:$0xff] }
 0x177   :  { %1445 = vst [vmem:[%s3304_s4 + $0x60] sm:$0xff] %v1429_v22  ;;  %v3176_v57 = vpop.eup %1721  ;;  %v1195_v14 = vadd.f32 1.0, %v1720_v24  ;;  %1747 = vtanh.f32 %v1011_v11  ;;  %v1019_v47 = vadd.f32 %v1018_v50, %v858_v35  ;;  %v1023_v0 = vadd.f32 %v1022_v19, %v862_v18  ;;  %v1339_v11 = vld [vmem:[%s3302_s3 + $0x10] sm:$0xff]  ;;  %v1340_v19 = vld [vmem:[%s3302_s3 + $0x18] sm:$0xff] }
 0x178   :  { %1446 = vst [vmem:[%s3304_s4 + $0x68] sm:$0xff] %v1430_v1  ;;  %v3178_v33 = vpop.eup %1723  ;;  %1749 = vpow2.f32 %v1536_v3  ;;  %v864_v34 = vadd.f32 %v3072_v13, %v3324_v6  ;;  %v989_v39 = vadd.f32 %v988_v42, %v828_v53  ;;  %v832_v45 = vadd.f32 %v3327_v31, %v3326_v59  ;;  %v994_v60 = vpop.f32.mrf.mxu0  ;;  %v3329_v3 = vld [vmem:[#allocation8_spill] sm:$0xff]  ;;  %v1344_v31 = vld [vmem:[%s3302_s3 + $0x38] sm:$0xff] }
 0x179   :  { %v1726_v17 = vpop.eup %1725  ;;  %1751 = vrcp.f32 %v1195_v14  ;;  %v1543_v37 = vmul.f32 -1.442695, %v987_v26  ;;  %v868_v49 = vadd.f32 %v3086_v27, %v3328_v52  ;;  %v834_v4 = vadd.f32 %v3329_v3, %v3326_v59  ;;  %v1030_v27 = vpop.f32.mrf.mxu1  ;;  %v1343_v53 = vld [vmem:[%s3302_s3 + $0x30] sm:$0xff] }
 0x17a   :  { %v3182_v56 = vpop.eup %1727  ;;  %v1196_v63 = vadd.f32 1.0, %v1726_v17  ;;  %1753 = vtanh.f32 %v1013_v8  ;;  %v1025_v29 = vadd.f32 %v1024_v32, %v864_v34  ;;  %v993_v38 = vadd.f32 %v992_v61, %v832_v45  ;;  %v998_v1 = vpop.f32.mrf.mxu0 }
 0x17b   :  { %v3186_v15 = vpop.eup %1729  ;;  %1755 = vpow2.f32 %v1539_v46  ;;  %v1544_v20 = vmul.f32 -1.442695, %v989_v39  ;;  %v838_v50 = vadd.f32 %v3331_v28, %v3330_v51  ;;  %v1029_v24 = vadd.f32 %v1028_v30, %v868_v49 }
 0x17c   :  { %v3190_v25 = vpop.eup %1731  ;;  %1757 = vrcp.f32 %v1196_v63  ;;  %v870_v14 = vadd.f32 %v3102_v5, %v3328_v52  ;;  %v1547_v54 = vmul.f32 -1.442695, %v993_v38  ;;  %v1191_v42 = vadd.f32 1.0, %v3176_v57  ;;  %v1000_v35 = vpop.f32.mrf.mxu0 }
 0x17d   :  { %v1734_v9 = vpop.eup %1733  ;;  %1759 = vpow2.f32 %v1556_v2  ;;  %v840_v63 = vadd.f32 %v3332_v41, %v3330_v51  ;;  %v999_v57 = vadd.f32 %v998_v1, %v838_v50 }
 0x17e   :  { %v3196_v55 = vpop.eup %1735  ;;  %v1199_v12 = vadd.f32 1.0, %v1734_v9  ;;  %1761 = vtanh.f32 %v1017_v23  ;;  %v1031_v5 = vadd.f32 %v1030_v27, %v870_v14  ;;  %v995_v23 = vadd.f32 %v994_v60, %v834_v4 }
 0x17f   :  { %v3198_v44 = vpop.eup %1737  ;;  %1763 = vpow2.f32 %v1540_v36 }
 0x180   :  { %v1740_v43 = vpop.eup %1739  ;;  %1765 = vrcp.f32 %v1199_v12 }
 0x181   :  { %v3204_v7 = vpop.eup %1741  ;;  %v1200_v62 = vadd.f32 1.0, %v1740_v43  ;;  %1767 = vtanh.f32 %v1019_v47  ;;  %v1001_v47 = vadd.f32 %v1000_v35, %v840_v63 }
 0x182   :  { %v3206_v40 = vpop.eup %1743  ;;  %1769 = vtanh.f32 %v1023_v0  ;;  %v1548_v0 = vmul.f32 -1.442695, %v995_v23 }
 0x183   :  { %v1746_v13 = vpop.eup %1745  ;;  %1771 = vrcp.f32 %v1200_v62 }
 0x184   :  { %v1748_v22 = vpop.eup %1747  ;;  %v1203_v58 = vadd.f32 1.0, %v1746_v13  ;;  %1773 = vpow2.f32 %v1543_v37  ;;  %v1552_v37 = vmul.f32 -1.442695, %v1001_v47  ;;  %v1347_v13 = vld [vmem:[%s3302_s3 + $0x50] sm:$0xff] }
 0x185   :  { %v1750_v48 = vpop.eup %1749  ;;  %1775 = vtanh.f32 %v1025_v29  ;;  %v1371_v2 = vmul.f32 %v1748_v22, %v3182_v56  ;;  %v1192_v56 = vadd.f32 1.0, %v3178_v33  ;;  %v1348_v22 = vld [vmem:[%s3302_s3 + $0x58] sm:$0xff] }
 0x186   :  { %v1752_v8 = vpop.eup %1751  ;;  %1777 = vrcp.f32 %v1203_v58  ;;  %v1204_v46 = vadd.f32 1.0, %v1750_v48 }
 0x187   :  { %v1754_v10 = vpop.eup %1753  ;;  %v1355_v17 = vmul.f32 %v1752_v8, %v1339_v11  ;;  %1779 = vpow2.f32 %v1544_v20  ;;  %v1223_v11 = vadd.f32 1.0, %v3204_v7 }
 0x188   :  { %v1756_v21 = vpop.eup %1755  ;;  %1781 = vrcp.f32 %v1204_v46  ;;  %v1372_v9 = vmul.f32 %v1754_v10, %v3186_v15  ;;  %v1551_v15 = vmul.f32 -1.442695, %v999_v57 }
 0x189   :  { %v1758_v36 = vpop.eup %1757  ;;  %v1387_v6 = vadd.f32 %v1371_v2, %v1355_v17  ;;  %v1207_v18 = vadd.f32 1.0, %v1756_v21  ;;  %1783 = vtanh.f32 %v1029_v24 }
 0x18a   :  { %v1760_v26 = vpop.eup %1759  ;;  %v1356_v61 = vmul.f32 %v1758_v36, %v1340_v19  ;;  %1785 = vpow2.f32 %v1547_v54 }
 0x18b   :  { %v1762_v16 = vpop.eup %1761  ;;  %1787 = vrcp.f32 %v1191_v42  ;;  %1451 = vst [vmem:[%s3303_s5 + $0x10] sm:$0xff] %v1387_v6  ;;  %v1224_v51 = vadd.f32 1.0, %v1760_v26  ;;  %v1352_v42 = vld [vmem:[%s3302_s3 + $0x78] sm:$0xff] }
 0x18c   :  { %v1764_v32 = vpop.eup %1763  ;;  %v1388_v12 = vadd.f32 %v1372_v9, %v1356_v61  ;;  %1789 = vrcp.f32 %v1207_v18  ;;  %v1375_v59 = vmul.f32 %v1762_v16, %v3190_v25 }
 0x18d   :  { %v1766_v33 = vpop.eup %1765  ;;  %v1208_v34 = vadd.f32 1.0, %v1764_v32  ;;  %1791 = vtanh.f32 %v1031_v5 }
 0x18e   :  { %v1768_v39 = vpop.eup %1767  ;;  %1793 = vrcp.f32 %v1192_v56  ;;  %1452 = vst [vmem:[%s3303_s5 + $0x18] sm:$0xff] %v1388_v12  ;;  %v1359_v43 = vmul.f32 %v1766_v33, %v1343_v53 }
 0x18f   :  { %v1770_v45 = vpop.eup %1769  ;;  %1795 = vrcp.f32 %v1208_v34  ;;  %v1376_v38 = vmul.f32 %v1768_v39, %v3196_v55 }
 0x190   :  { %v1772_v60 = vpop.eup %1771  ;;  %v1391_v62 = vadd.f32 %v1375_v59, %v1359_v43  ;;  %1797 = vpow2.f32 %v1548_v0  ;;  %v1379_v1 = vmul.f32 %v1770_v45, %v3198_v44  ;;  %v1351_v44 = vld [vmem:[%s3302_s3 + $0x70] sm:$0xff] }
 0x191   :  { %v1774_v29 = vpop.eup %1773  ;;  %v1360_v30 = vmul.f32 %v1772_v60, %v1344_v31  ;;  %1799 = vpow2.f32 %v1551_v15 }
 0x192   :  { %v1776_v25 = vpop.eup %1775  ;;  %1801 = vtanh.f32 %v1387_v6  ;;  %1455 = vst [vmem:[%s3303_s5 + $0x30] sm:$0xff] %v1391_v62  ;;  %v1211_v52 = vadd.f32 1.0, %v1774_v29 }
 0x193   :  { %v1778_v49 = vpop.eup %1777  ;;  %v1392_v20 = vadd.f32 %v1376_v38, %v1360_v30  ;;  %1803 = vpow2.f32 %v1552_v37  ;;  %v1380_v24 = vmul.f32 %v1776_v25, %v3206_v40 }
 0x194   :  { %v1780_v55 = vpop.eup %1779  ;;  %v1363_v58 = vmul.f32 %v1778_v49, %v1347_v13  ;;  %1805 = vrcp.f32 %v1211_v52 }
 0x195   :  { %v1782_v48 = vpop.eup %1781  ;;  %1807 = vtanh.f32 %v1388_v12  ;;  %1456 = vst [vmem:[%s3303_s5 + $0x38] sm:$0xff] %v1392_v20  ;;  %v1212_v3 = vadd.f32 1.0, %v1780_v55 }
 0x196   :  { %v1784_v4 = vpop.eup %1783  ;;  %v1395_v28 = vadd.f32 %v1379_v1, %v1363_v58  ;;  %v1364_v50 = vmul.f32 %v1782_v48, %v1348_v22 }
 0x197   :  { %v1786_v27 = vpop.eup %1785  ;;  %1809 = vrcp.f32 %v1212_v3 }
 0x198   :  { %v1788_v7 = vpop.eup %1787  ;;  %1811 = vrcp.f32 %v1223_v11  ;;  %1459 = vst [vmem:[%s3303_s5 + $0x50] sm:$0xff] %v1395_v28  ;;  %v1396_v8 = vadd.f32 %v1380_v24, %v1364_v50  ;;  %v1215_v14 = vadd.f32 1.0, %v1786_v27 }
 0x199   :  { %v1790_v46 = vpop.eup %1789  ;;  %1813 = vtanh.f32 %v1391_v62  ;;  %v1383_v10 = vmul.f32 %v1788_v7, %v1784_v4 }
 0x19a   :  { %v1792_v54 = vpop.eup %1791  ;;  %1815 = vrcp.f32 %v1224_v51  ;;  %1460 = vst [vmem:[%s3303_s5 + $0x58] sm:$0xff] %v1396_v8  ;;  %v1367_v40 = vmul.f32 %v1790_v46, %v1351_v44 }
 0x19b   :  { %v1794_v17 = vpop.eup %1793  ;;  %1817 = vrcp.f32 %v1215_v14 }
 0x19c   :  { %v1796_v2 = vpop.eup %1795  ;;  %1819 = vtanh.f32 %v1392_v20  ;;  %v1399_v19 = vadd.f32 %v1383_v10, %v1367_v40  ;;  %v1384_v63 = vmul.f32 %v1794_v17, %v1792_v54 }
 0x19d   :  { %v1798_v21 = vpop.eup %1797  ;;  %1821 = vtanh.f32 %v1395_v28  ;;  %v1368_v41 = vmul.f32 %v1796_v2, %v1352_v42 }
 0x19e   :  { %v1800_v5 = vpop.eup %1799  ;;  %1823 = vtanh.f32 %v1399_v19  ;;  %1463 = vst [vmem:[%s3303_s5 + $0x70] sm:$0xff] %v1399_v19  ;;  %v1216_v23 = vadd.f32 1.0, %v1798_v21 }
 0x19f   :  { %v1802_v35 = vpop.eup %1801  ;;  %1825 = vtanh.f32 %v1396_v8  ;;  %v1400_v36 = vadd.f32 %v1384_v63, %v1368_v41  ;;  %v1219_v6 = vadd.f32 1.0, %v1800_v5 }
 0x1a0   :  { %v1804_v18 = vpop.eup %1803  ;;  %1827 = vrcp.f32 %v1216_v23 }
 0x1a1   :  { %v1806_v57 = vpop.eup %1805  ;;  %1829 = vtanh.f32 %v1400_v36  ;;  %1464 = vst [vmem:[%s3303_s5 + $0x78] sm:$0xff] %v1400_v36  ;;  %v1220_v26 = vadd.f32 1.0, %v1804_v18 }
 0x1a2   :  { %v1808_v56 = vpop.eup %1807  ;;  %v1419_v61 = vmul.f32 %v1806_v57, %v1802_v35  ;;  %1831 = vrcp.f32 %v1219_v6 }
 0x1a3   :  { %1833 = vrcp.f32 %v1220_v26 }
 0x1a4   :  { %v1810_v9 = vpop.eup %1809  ;;  %1435 = vst [vmem:[%s3304_s4 + $0x10] sm:$0xff] %v1419_v61 }
 0x1a5   :  { %v1812_v16 = vpop.eup %1811  ;;  %v1420_v53 = vmul.f32 %v1810_v9, %v1808_v56 }
 0x1a6   :  { %v1814_v47 = vpop.eup %1813 }
 0x1a7   :  { %v1816_v32 = vpop.eup %1815  ;;  %1436 = vst [vmem:[%s3304_s4 + $0x18] sm:$0xff] %v1420_v53 }
 0x1a8   :  { %v1818_v12 = vpop.eup %1817 }
 0x1a9   :  { %v1820_v0 = vpop.eup %1819  ;;  %v1423_v33 = vmul.f32 %v1818_v12, %v1814_v47 }
 0x1aa   :  { %v1822_v34 = vpop.eup %1821 }
 0x1ab   :  { %v1824_v15 = vpop.eup %1823  ;;  %1439 = vst [vmem:[%s3304_s4 + $0x30] sm:$0xff] %v1423_v33 }
 0x1ac   :  { %v1826_v39 = vpop.eup %1825  ;;  %v1431_v43 = vmul.f32 %v1824_v15, %v1812_v16 }
 0x1ad   :  { %v1828_v59 = vpop.eup %1827 }
 0x1ae   :  { %v1830_v31 = vpop.eup %1829  ;;  %1447 = vst [vmem:[%s3304_s4 + $0x70] sm:$0xff] %v1431_v43  ;;  %v1424_v45 = vmul.f32 %v1828_v59, %v1820_v0 }
 0x1af   :  { %v1832_v37 = vpop.eup %1831  ;;  %v1432_v60 = vmul.f32 %v1830_v31, %v1816_v32 }
 0x1b0   :  { %v1834_v62 = vpop.eup %1833  ;;  %1440 = vst [vmem:[%s3304_s4 + $0x38] sm:$0xff] %v1424_v45  ;;  %v1427_v29 = vmul.f32 %v1832_v37, %v1822_v34 }
 0x1b1   :  { %1448 = vst [vmem:[%s3304_s4 + $0x78] sm:$0xff] %v1432_v60  ;;  %v1428_v30 = vmul.f32 %v1834_v62, %v1826_v39 }
 0x1b2   :  { %1443 = vst [vmem:[%s3304_s4 + $0x50] sm:$0xff] %v1427_v29 }
 0x1b3   :  { %1444 = vst [vmem:[%s3304_s4 + $0x58] sm:$0xff] %v1428_v30 }

</bundles_post_ra>
